<compile_context>
chip_gen: v7x
topology: tpu7x:2x2x1
jax: 0.10.0
libtpu: 0.0.40
codegen_flags: <defaults>
</compile_context>

<pallas_src>
import functools

import jax
import jax.numpy as jnp
import numpy as np
from jax.experimental import pallas as pl
from jax.experimental.pallas import tpu as pltpu

EPS = 1e-5
LEAKY_SLOPE = 0.2   # nn.LeakyReLU(negative_slope=0.2) everywhere in the module


def _leaky(x):
    return jnp.where(x >= 0.0, x, LEAKY_SLOPE * x)


def _dot(a, b):
    # bf16 operands, f32 MXU accumulation.
    return jnp.dot(a.astype(jnp.bfloat16), b.astype(jnp.bfloat16),
                   preferred_element_type=jnp.float32)


def _bn_over_rows(x, gamma, beta):
    # torch.nn.BatchNorm1d on a (rows, C) slab, training mode: batch statistics
    # (biased variance), eps=1e-5, per-channel affine.  f32 throughout.
    # TODO(synk): eval-mode running_mean/running_var not implemented (train-mode parity only).
    mean = jnp.mean(x, axis=0, keepdims=True)
    var = jnp.mean(jnp.square(x - mean), axis=0, keepdims=True)
    return (x - mean) * jax.lax.rsqrt(var + EPS) * gamma + beta


# ----------------------------------------------------------------------------
# Fused Pallas kernel: einsum scalings + gcn/gcn1/gcn2 + bn1/bn2/bn3 + fcn head
# ----------------------------------------------------------------------------
def _gnn_fused_kernel(s_ref, nf_ref,
                      g0w, g0b, g1w, g1b, bn1g, bn1b,
                      g2w, g2b, bn2g, bn2b,
                      g3w, g3b, g4w, g4b,
                      bn3g,
                      f0wp, f0b, f1w, f1b, f2w, f2b,
                      o_ref):
    """s_ref: (bz*roi, 1) adjacency row-sums; nf_ref: (bz*roi, F) node features.

    Row i of every (bz*roi, ·) slab corresponds to (batch b, roi channel r) with
    i = b*roi + r.  f0wp is the fcn first-layer weight permuted to (8, roi, 256);
    f0b already contains the folded bn3 beta contribution.  o_ref: (bz, 2) logits.
    """
    br = s_ref.shape[0]
    roi = bn3g.shape[1]
    feat = g4w.shape[1]          # 8
    bz = br // roi

    s = s_ref[...]                                                   # (br, 1) f32

    # einsum('ijk,ijp->ijp', m, x) == rowsum(m) * x ; rowsum precomputed in wrapper.
    # gcn: Linear -> LeakyReLU -> Linear, then bn1
    x = s * nf_ref[...]
    x = _leaky(_dot(x, g0w[...]) + g0b[...])
    x = _dot(x, g1w[...]) + g1b[...]
    x = _bn_over_rows(x, bn1g[...], bn1b[...])

    # gcn1: Linear -> LeakyReLU, then bn2
    x = _leaky(_dot(s * x, g2w[...]) + g2b[...])
    x = _bn_over_rows(x, bn2g[...], bn2b[...])

    # gcn2: Linear(roi,64) -> LeakyReLU -> Linear(64,8) -> LeakyReLU
    x = _leaky(_dot(s * x, g3w[...]) + g3b[...])
    z = _leaky(_dot(x, g4w[...]) + g4b[...])                         # (br, feat) f32

    # ---- bn3: BatchNorm1d(roi) over the (bz, roi, feat) tensor (channel = roi) ----
    # Row->channel one-hot selector built in-kernel (no HBM constants, no int div):
    # selT[i, r] = 1  iff  i == b*roi + r for some batch b.
    row = jax.lax.broadcasted_iota(jnp.int32, (br, roi), 0)
    col = jax.lax.broadcasted_iota(jnp.int32, (br, roi), 1)
    selT = jnp.zeros((br, roi), jnp.float32)
    for b in range(bz):                                              # static unroll (bz small)
        selT = selT + (row == col + b * roi).astype(jnp.float32)

    inv_n = 1.0 / float(bz * feat)
    row_sum = jnp.sum(z, axis=-1, keepdims=True)                     # (br, 1)
    mu_r = jnp.sum(selT * row_sum, axis=0, keepdims=True) * inv_n    # (1, roi) per-channel mean
    mu_rows = jnp.sum(selT * mu_r, axis=1, keepdims=True)            # (br, 1) broadcast to rows
    zc = z - mu_rows
    sq_sum = jnp.sum(zc * zc, axis=-1, keepdims=True)                # (br, 1)
    var_r = jnp.sum(selT * sq_sum, axis=0, keepdims=True) * inv_n    # (1, roi) biased variance
    a_r = jax.lax.rsqrt(var_r + EPS) * bn3g[...]                     # (1, roi) inv_std * gamma
    a_rows = jnp.sum(selT * a_r, axis=1, keepdims=True)              # (br, 1)
    zs = zc * a_rows                                                 # bn3 output minus beta
    # (bn3 beta term is folded into f0b by the wrapper: beta @ colsum_f(W0))

    # ---- fcn layer 1 contracted directly from the (br, feat) layout ----
    #   y1[b, o] = sum_{r,f} zs[b*roi+r, f] * W0[r*feat+f, o]
    # selT routes every row to its own (roi, 256) weight slice; bsel sums rows per batch.
    m_acc = jnp.zeros((br, f0wp.shape[2]), jnp.float32)
    for f in range(feat):                                            # feat == 8, static unroll
        m_acc = m_acc + _dot(zs[:, f:f + 1] * selT, f0wp[f])

    brow = jax.lax.broadcasted_iota(jnp.int32, (bz, br), 0)
    bcol = jax.lax.broadcasted_iota(jnp.int32, (bz, br), 1)
    lo = brow * roi
    bsel = jnp.logical_and(bcol >= lo, bcol < lo + roi).astype(jnp.float32)   # (bz, br)

    y = _leaky(_dot(bsel, m_acc) + f0b[...])                         # (bz, 256)
    y = _leaky(_dot(y, f1w[...]) + f1b[...])                         # (bz, 32)
    o_ref[...] = _dot(y, f2w[...]) + f2b[...]                        # (bz, 2)


# ----------------------------------------------------------------------------
# Jitted forward
# ----------------------------------------------------------------------------
_VMEM = pl.BlockSpec(memory_space=pltpu.MemorySpace.VMEM)


@jax.jit
def gnn_predictor_forward(m, node_feature, params):
    """GNNPredictor.forward.  m: (bz, roi, roi), node_feature: (bz, roi, node_input_dim)."""
    bz, roi, _ = m.shape
    feat = params["g4_w"].shape[1]                                   # 8
    br = bz * roi
    f32, bf16 = jnp.float32, jnp.bfloat16

    # Only the row-sum of m is ever used by the model -> compute it here (XLA),
    # never DMA the full (bz, roi, roi) adjacency into the kernel.
    s = jnp.sum(m.astype(f32), axis=-1).reshape(br, 1)
    nf = node_feature.astype(f32).reshape(br, -1)

    # fcn first-layer weight: rows indexed by c = r*feat + f (torch .view(bz,-1) order).
    w0 = params["f0_w"].astype(f32)                                  # (feat*roi, 256)
    w0_3d = w0.reshape(roi, feat, -1)
    f0_wp = jnp.transpose(w0_3d, (1, 0, 2)).astype(bf16)             # (feat, roi, 256)
    w0_colsum = jnp.sum(w0_3d, axis=1)                               # (roi, 256)
    # Fold the bn3 beta (per-channel additive) term into the fcn bias.
    f0_b_eff = params["f0_b"] + params["bn3_b"] @ w0_colsum          # (1, 256)

    args = (
        s, nf,
        params["g0_w"].astype(bf16), params["g0_b"],
        params["g1_w"].astype(bf16), params["g1_b"],
        params["bn1_g"], params["bn1_b"],
        params["g2_w"].astype(bf16), params["g2_b"],
        params["bn2_g"], params["bn2_b"],
        params["g3_w"].astype(bf16), params["g3_b"],
        params["g4_w"].astype(bf16), params["g4_b"],
        params["bn3_g"],
        f0_wp, f0_b_eff,
        params["f1_w"].astype(bf16), params["f1_b"],
        params["f2_w"].astype(bf16), params["f2_b"],
    )

    node_dim = nf.shape[1]
    flops = 2 * br * (node_dim * roi + 2 * roi * roi + roi * 64 + 64 * feat
                      + feat * roi * 256) \
            + 2 * bz * (br * 256 + 256 * 32 + 32 * 2)
    bytes_accessed = sum(int(np.prod(a.shape)) * a.dtype.itemsize for a in args) + bz * 2 * 4

    logits = pl.pallas_call(
        _gnn_fused_kernel,
        out_shape=jax.ShapeDtypeStruct((bz, 2), f32),
        in_specs=[_VMEM] * len(args),
        out_specs=_VMEM,
        compiler_params=pltpu.CompilerParams(vmem_limit_bytes=32 * 1024 * 1024),
        cost_estimate=pl.CostEstimate(flops=int(flops), transcendentals=3 * roi,
                                      bytes_accessed=int(bytes_accessed)),
    )(*args)
    return logits


# ----------------------------------------------------------------------------
# Pure-JAX reference (mirrors the PyTorch forward) for correctness checking
# ----------------------------------------------------------------------------
def gnn_predictor_ref(m, node_feature, params):
    bz, roi, _ = m.shape
    with jax.default_matmul_precision("highest"):
        s = jnp.sum(m, axis=-1, keepdims=True)
        x = s * node_feature
        x = _leaky(x @ params["g0_w"] + params["g0_b"])
        x = x @ params["g1_w"] + params["g1_b"]
        x = _bn_over_rows(x.reshape(bz * roi, -1),
                          params["bn1_g"], params["bn1_b"]).reshape(bz, roi, -1)
        x = s * x
        x = _leaky(x @ params["g2_w"] + params["g2_b"])
        x = _bn_over_rows(x.reshape(bz * roi, -1),
                          params["bn2_g"], params["bn2_b"]).reshape(bz, roi, -1)
        x = s * x
        x = _leaky(x @ params["g3_w"] + params["g3_b"])
        x = _leaky(x @ params["g4_w"] + params["g4_b"])              # (bz, roi, 8)
        # bn3: BatchNorm1d(roi) on 3-D input -> channel axis is roi (dim 1)
        mu = jnp.mean(x, axis=(0, 2), keepdims=True)
        var = jnp.mean(jnp.square(x - mu), axis=(0, 2), keepdims=True)
        g3 = params["bn3_g"].reshape(1, roi, 1)
        b3 = params["bn3_b"].reshape(1, roi, 1)
        x = (x - mu) * jax.lax.rsqrt(var + EPS) * g3 + b3
        x = x.reshape(bz, roi * 8)
        x = _leaky(x @ params["f0_w"] + params["f0_b"])
        x = _leaky(x @ params["f1_w"] + params["f1_b"])
        return x @ params["f2_w"] + params["f2_b"]


# ----------------------------------------------------------------------------
# Deterministic parameter init (shapes follow the module __init__).
# NOTE: weights are stored (in, out); a real PyTorch state_dict is (out, in) and
# must be transposed before use.
# ----------------------------------------------------------------------------
def _init_linear(key, fin, fout):
    k1, k2 = jax.random.split(key)
    lim = 1.0 / np.sqrt(fin)
    w = jax.random.uniform(k1, (fin, fout), jnp.float32, -lim, lim)
    b = jax.random.uniform(k2, (1, fout), jnp.float32, -lim, lim)
    return w, b


def init_params(seed, *, roi, node_feat):
    keys = jax.random.split(jax.random.PRNGKey(seed), 12)
    p = {}
    p["g0_w"], p["g0_b"] = _init_linear(keys[0], node_feat, roi)     # gcn.Linear(node_in, roi)
    p["g1_w"], p["g1_b"] = _init_linear(keys[1], roi, roi)           # gcn.Linear(roi, roi)
    p["g2_w"], p["g2_b"] = _init_linear(keys[2], roi, roi)           # gcn1.Linear(roi, roi)
    p["g3_w"], p["g3_b"] = _init_linear(keys[3], roi, 64)            # gcn2.Linear(roi, 64)
    p["g4_w"], p["g4_b"] = _init_linear(keys[4], 64, 8)              # gcn2.Linear(64, 8)
    p["f0_w"], p["f0_b"] = _init_linear(keys[5], 8 * roi, 256)       # fcn
    p["f1_w"], p["f1_b"] = _init_linear(keys[6], 256, 32)
    p["f2_w"], p["f2_b"] = _init_linear(keys[7], 32, 2)
    # BatchNorm affines (randomized around PyTorch's gamma=1/beta=0 init so the
    # affine path is actually exercised by the reference check)
    for i, name in enumerate(("bn1", "bn2", "bn3")):
        kg, kb = jax.random.split(keys[8 + i])
        p[f"{name}_g"] = 1.0 + 0.1 * jax.random.normal(kg, (1, roi), jnp.float32)
        p[f"{name}_b"] = 0.1 * jax.random.normal(kb, (1, roi), jnp.float32)
    return p


# ----------------------------------------------------------------------------
if __name__ == "__main__":
    # Small config consistent with GNNPredictor(node_input_dim=8, roi_num=8), batch=2
    B, ROI, NODE_FEAT = 2, 8, 8
    params = init_params(42, roi=ROI, node_feat=NODE_FEAT)

    k1, k2 = jax.random.split(jax.random.PRNGKey(0))
    m = jax.random.normal(k1, (B, ROI, ROI), jnp.float32)
    node_feature = jax.random.normal(k2, (B, ROI, NODE_FEAT), jnp.float32)

    logits = gnn_predictor_forward(m, node_feature, params)
    jax.block_until_ready(logits)
    assert logits.shape == (B, 2)

    ref = gnn_predictor_ref(m, node_feature, params)
    np.testing.assert_allclose(np.asarray(logits), np.asarray(ref), rtol=5e-2, atol=5e-2)

    print("KERNEL_OK")
</pallas_src>

<mosaic_0001>
module attributes {stable_mosaic.version = 11 : i64} {
  func.func @_gnn_fused_kernel(%arg0: memref<16x1xf32, #tpu.memory_space<vmem>>, %arg1: memref<16x8xf32, #tpu.memory_space<vmem>>, %arg2: memref<8x8xbf16, #tpu.memory_space<vmem>>, %arg3: memref<1x8xf32, #tpu.memory_space<vmem>>, %arg4: memref<8x8xbf16, #tpu.memory_space<vmem>>, %arg5: memref<1x8xf32, #tpu.memory_space<vmem>>, %arg6: memref<1x8xf32, #tpu.memory_space<vmem>>, %arg7: memref<1x8xf32, #tpu.memory_space<vmem>>, %arg8: memref<8x8xbf16, #tpu.memory_space<vmem>>, %arg9: memref<1x8xf32, #tpu.memory_space<vmem>>, %arg10: memref<1x8xf32, #tpu.memory_space<vmem>>, %arg11: memref<1x8xf32, #tpu.memory_space<vmem>>, %arg12: memref<8x64xbf16, #tpu.memory_space<vmem>>, %arg13: memref<1x64xf32, #tpu.memory_space<vmem>>, %arg14: memref<64x8xbf16, #tpu.memory_space<vmem>>, %arg15: memref<1x8xf32, #tpu.memory_space<vmem>>, %arg16: memref<1x8xf32, #tpu.memory_space<vmem>>, %arg17: memref<8x8x256xbf16, #tpu.memory_space<vmem>>, %arg18: memref<1x256xf32, #tpu.memory_space<vmem>>, %arg19: memref<256x32xbf16, #tpu.memory_space<vmem>>, %arg20: memref<1x32xf32, #tpu.memory_space<vmem>>, %arg21: memref<32x2xbf16, #tpu.memory_space<vmem>>, %arg22: memref<1x2xf32, #tpu.memory_space<vmem>>, %arg23: memref<2x2xf32, #tpu.memory_space<vmem>>) attributes {dimension_semantics = [], scalar_prefetch = 0 : i64, scratch_operands = 0 : i64, tpu.core_type = #tpu.core_type<tc>} {
    %c0 = arith.constant 0 : index
    %c0_0 = arith.constant 0 : index
    %0 = vector.load %arg0[%c0, %c0_0] : memref<16x1xf32, #tpu.memory_space<vmem>>, vector<16x1xf32>
    %c0_1 = arith.constant 0 : index
    %c0_2 = arith.constant 0 : index
    %1 = vector.load %arg1[%c0_1, %c0_2] : memref<16x8xf32, #tpu.memory_space<vmem>>, vector<16x8xf32>
    %2 = vector.broadcast %0 : vector<16x1xf32> to vector<16x8xf32>
    %3 = arith.mulf %2, %1 : vector<16x8xf32>
    %c0_3 = arith.constant 0 : index
    %c0_4 = arith.constant 0 : index
    %4 = vector.load %arg2[%c0_3, %c0_4] : memref<8x8xbf16, #tpu.memory_space<vmem>>, vector<8x8xbf16>
    %5 = arith.truncf %3 : vector<16x8xf32> to vector<16x8xbf16>
    %cst = arith.constant dense<0.000000e+00> : vector<16x8xf32>
    %6 = tpu.matmul %5, %4, %cst {dimension_numbers = #tpu.dot_dimension_numbers<[1], [0], [0], [1], [0, 0, 1, 1], [], []>} : vector<16x8xbf16>, vector<8x8xbf16>, vector<16x8xf32> -> vector<16x8xf32>
    %c0_5 = arith.constant 0 : index
    %c0_6 = arith.constant 0 : index
    %7 = vector.load %arg3[%c0_5, %c0_6] : memref<1x8xf32, #tpu.memory_space<vmem>>, vector<1x8xf32>
    %8 = vector.broadcast %7 : vector<1x8xf32> to vector<16x8xf32>
    %9 = arith.addf %6, %8 : vector<16x8xf32>
    %cst_7 = arith.constant 0.000000e+00 : f32
    %10 = vector.broadcast %cst_7 : f32 to vector<16x8xf32>
    %11 = arith.cmpf oge, %9, %10 : vector<16x8xf32>
    %cst_8 = arith.constant 2.000000e-01 : f32
    %12 = vector.broadcast %cst_8 : f32 to vector<16x8xf32>
    %13 = arith.mulf %12, %9 : vector<16x8xf32>
    %14 = arith.select %11, %9, %13 : vector<16x8xi1>, vector<16x8xf32>
    %c0_9 = arith.constant 0 : index
    %c0_10 = arith.constant 0 : index
    %15 = vector.load %arg4[%c0_9, %c0_10] : memref<8x8xbf16, #tpu.memory_space<vmem>>, vector<8x8xbf16>
    %16 = arith.truncf %14 : vector<16x8xf32> to vector<16x8xbf16>
    %cst_11 = arith.constant dense<0.000000e+00> : vector<16x8xf32>
    %17 = tpu.matmul %16, %15, %cst_11 {dimension_numbers = #tpu.dot_dimension_numbers<[1], [0], [0], [1], [0, 0, 1, 1], [], []>} : vector<16x8xbf16>, vector<8x8xbf16>, vector<16x8xf32> -> vector<16x8xf32>
    %c0_12 = arith.constant 0 : index
    %c0_13 = arith.constant 0 : index
    %18 = vector.load %arg5[%c0_12, %c0_13] : memref<1x8xf32, #tpu.memory_space<vmem>>, vector<1x8xf32>
    %19 = vector.broadcast %18 : vector<1x8xf32> to vector<16x8xf32>
    %20 = arith.addf %17, %19 : vector<16x8xf32>
    %c0_14 = arith.constant 0 : index
    %c0_15 = arith.constant 0 : index
    %21 = vector.load %arg6[%c0_14, %c0_15] : memref<1x8xf32, #tpu.memory_space<vmem>>, vector<1x8xf32>
    %c0_16 = arith.constant 0 : index
    %c0_17 = arith.constant 0 : index
    %22 = vector.load %arg7[%c0_16, %c0_17] : memref<1x8xf32, #tpu.memory_space<vmem>>, vector<1x8xf32>
    %cst_18 = arith.constant dense<0.000000e+00> : vector<8xf32>
    %23 = vector.multi_reduction <add>, %20, %cst_18 [0] : vector<16x8xf32> to vector<8xf32>
    %24 = vector.shape_cast %23 : vector<8xf32> to vector<1x8xf32>
    %cst_19 = arith.constant 1.600000e+01 : f32
    %25 = vector.broadcast %cst_19 : f32 to vector<1x8xf32>
    %26 = arith.divf %24, %25 : vector<1x8xf32>
    %27 = vector.broadcast %26 : vector<1x8xf32> to vector<16x8xf32>
    %28 = arith.subf %20, %27 : vector<16x8xf32>
    %29 = arith.mulf %28, %28 : vector<16x8xf32>
    %cst_20 = arith.constant dense<0.000000e+00> : vector<8xf32>
    %30 = vector.multi_reduction <add>, %29, %cst_20 [0] : vector<16x8xf32> to vector<8xf32>
    %31 = vector.shape_cast %30 : vector<8xf32> to vector<1x8xf32>
    %cst_21 = arith.constant 1.600000e+01 : f32
    %32 = vector.broadcast %cst_21 : f32 to vector<1x8xf32>
    %33 = arith.divf %31, %32 : vector<1x8xf32>
    %34 = vector.broadcast %26 : vector<1x8xf32> to vector<16x8xf32>
    %35 = arith.subf %20, %34 : vector<16x8xf32>
    %cst_22 = arith.constant 9.99999974E-6 : f32
    %36 = vector.broadcast %cst_22 : f32 to vector<1x8xf32>
    %37 = arith.addf %33, %36 : vector<1x8xf32>
    %38 = math.rsqrt %37 : vector<1x8xf32>
    %39 = vector.broadcast %38 : vector<1x8xf32> to vector<16x8xf32>
    %40 = arith.mulf %35, %39 : vector<16x8xf32>
    %41 = vector.broadcast %21 : vector<1x8xf32> to vector<16x8xf32>
    %42 = arith.mulf %40, %41 : vector<16x8xf32>
    %43 = vector.broadcast %22 : vector<1x8xf32> to vector<16x8xf32>
    %44 = arith.addf %42, %43 : vector<16x8xf32>
    %45 = vector.broadcast %0 : vector<16x1xf32> to vector<16x8xf32>
    %46 = arith.mulf %45, %44 : vector<16x8xf32>
    %c0_23 = arith.constant 0 : index
    %c0_24 = arith.constant 0 : index
    %47 = vector.load %arg8[%c0_23, %c0_24] : memref<8x8xbf16, #tpu.memory_space<vmem>>, vector<8x8xbf16>
    %48 = arith.truncf %46 : vector<16x8xf32> to vector<16x8xbf16>
    %cst_25 = arith.constant dense<0.000000e+00> : vector<16x8xf32>
    %49 = tpu.matmul %48, %47, %cst_25 {dimension_numbers = #tpu.dot_dimension_numbers<[1], [0], [0], [1], [0, 0, 1, 1], [], []>} : vector<16x8xbf16>, vector<8x8xbf16>, vector<16x8xf32> -> vector<16x8xf32>
    %c0_26 = arith.constant 0 : index
    %c0_27 = arith.constant 0 : index
    %50 = vector.load %arg9[%c0_26, %c0_27] : memref<1x8xf32, #tpu.memory_space<vmem>>, vector<1x8xf32>
    %51 = vector.broadcast %50 : vector<1x8xf32> to vector<16x8xf32>
    %52 = arith.addf %49, %51 : vector<16x8xf32>
    %cst_28 = arith.constant 0.000000e+00 : f32
    %53 = vector.broadcast %cst_28 : f32 to vector<16x8xf32>
    %54 = arith.cmpf oge, %52, %53 : vector<16x8xf32>
    %cst_29 = arith.constant 2.000000e-01 : f32
    %55 = vector.broadcast %cst_29 : f32 to vector<16x8xf32>
    %56 = arith.mulf %55, %52 : vector<16x8xf32>
    %57 = arith.select %54, %52, %56 : vector<16x8xi1>, vector<16x8xf32>
    %c0_30 = arith.constant 0 : index
    %c0_31 = arith.constant 0 : index
    %58 = vector.load %arg10[%c0_30, %c0_31] : memref<1x8xf32, #tpu.memory_space<vmem>>, vector<1x8xf32>
    %c0_32 = arith.constant 0 : index
    %c0_33 = arith.constant 0 : index
    %59 = vector.load %arg11[%c0_32, %c0_33] : memref<1x8xf32, #tpu.memory_space<vmem>>, vector<1x8xf32>
    %cst_34 = arith.constant dense<0.000000e+00> : vector<8xf32>
    %60 = vector.multi_reduction <add>, %57, %cst_34 [0] : vector<16x8xf32> to vector<8xf32>
    %61 = vector.shape_cast %60 : vector<8xf32> to vector<1x8xf32>
    %cst_35 = arith.constant 1.600000e+01 : f32
    %62 = vector.broadcast %cst_35 : f32 to vector<1x8xf32>
    %63 = arith.divf %61, %62 : vector<1x8xf32>
    %64 = vector.broadcast %63 : vector<1x8xf32> to vector<16x8xf32>
    %65 = arith.subf %57, %64 : vector<16x8xf32>
    %66 = arith.mulf %65, %65 : vector<16x8xf32>
    %cst_36 = arith.constant dense<0.000000e+00> : vector<8xf32>
    %67 = vector.multi_reduction <add>, %66, %cst_36 [0] : vector<16x8xf32> to vector<8xf32>
    %68 = vector.shape_cast %67 : vector<8xf32> to vector<1x8xf32>
    %cst_37 = arith.constant 1.600000e+01 : f32
    %69 = vector.broadcast %cst_37 : f32 to vector<1x8xf32>
    %70 = arith.divf %68, %69 : vector<1x8xf32>
    %71 = vector.broadcast %63 : vector<1x8xf32> to vector<16x8xf32>
    %72 = arith.subf %57, %71 : vector<16x8xf32>
    %cst_38 = arith.constant 9.99999974E-6 : f32
    %73 = vector.broadcast %cst_38 : f32 to vector<1x8xf32>
    %74 = arith.addf %70, %73 : vector<1x8xf32>
    %75 = math.rsqrt %74 : vector<1x8xf32>
    %76 = vector.broadcast %75 : vector<1x8xf32> to vector<16x8xf32>
    %77 = arith.mulf %72, %76 : vector<16x8xf32>
    %78 = vector.broadcast %58 : vector<1x8xf32> to vector<16x8xf32>
    %79 = arith.mulf %77, %78 : vector<16x8xf32>
    %80 = vector.broadcast %59 : vector<1x8xf32> to vector<16x8xf32>
    %81 = arith.addf %79, %80 : vector<16x8xf32>
    %82 = vector.broadcast %0 : vector<16x1xf32> to vector<16x8xf32>
    %83 = arith.mulf %82, %81 : vector<16x8xf32>
    %c0_39 = arith.constant 0 : index
    %c0_40 = arith.constant 0 : index
    %84 = vector.load %arg12[%c0_39, %c0_40] : memref<8x64xbf16, #tpu.memory_space<vmem>>, vector<8x64xbf16>
    %85 = arith.truncf %83 : vector<16x8xf32> to vector<16x8xbf16>
    %cst_41 = arith.constant dense<0.000000e+00> : vector<16x64xf32>
    %86 = tpu.matmul %85, %84, %cst_41 {dimension_numbers = #tpu.dot_dimension_numbers<[1], [0], [0], [1], [0, 0, 1, 1], [], []>} : vector<16x8xbf16>, vector<8x64xbf16>, vector<16x64xf32> -> vector<16x64xf32>
    %c0_42 = arith.constant 0 : index
    %c0_43 = arith.constant 0 : index
    %87 = vector.load %arg13[%c0_42, %c0_43] : memref<1x64xf32, #tpu.memory_space<vmem>>, vector<1x64xf32>
    %88 = vector.broadcast %87 : vector<1x64xf32> to vector<16x64xf32>
    %89 = arith.addf %86, %88 : vector<16x64xf32>
    %cst_44 = arith.constant 0.000000e+00 : f32
    %90 = vector.broadcast %cst_44 : f32 to vector<16x64xf32>
    %91 = arith.cmpf oge, %89, %90 : vector<16x64xf32>
    %cst_45 = arith.constant 2.000000e-01 : f32
    %92 = vector.broadcast %cst_45 : f32 to vector<16x64xf32>
    %93 = arith.mulf %92, %89 : vector<16x64xf32>
    %94 = arith.select %91, %89, %93 : vector<16x64xi1>, vector<16x64xf32>
    %c0_46 = arith.constant 0 : index
    %c0_47 = arith.constant 0 : index
    %95 = vector.load %arg14[%c0_46, %c0_47] : memref<64x8xbf16, #tpu.memory_space<vmem>>, vector<64x8xbf16>
    %96 = arith.truncf %94 : vector<16x64xf32> to vector<16x64xbf16>
    %cst_48 = arith.constant dense<0.000000e+00> : vector<16x8xf32>
    %97 = tpu.matmul %96, %95, %cst_48 {dimension_numbers = #tpu.dot_dimension_numbers<[1], [0], [0], [1], [0, 0, 1, 1], [], []>} : vector<16x64xbf16>, vector<64x8xbf16>, vector<16x8xf32> -> vector<16x8xf32>
    %c0_49 = arith.constant 0 : index
    %c0_50 = arith.constant 0 : index
    %98 = vector.load %arg15[%c0_49, %c0_50] : memref<1x8xf32, #tpu.memory_space<vmem>>, vector<1x8xf32>
    %99 = vector.broadcast %98 : vector<1x8xf32> to vector<16x8xf32>
    %100 = arith.addf %97, %99 : vector<16x8xf32>
    %cst_51 = arith.constant 0.000000e+00 : f32
    %101 = vector.broadcast %cst_51 : f32 to vector<16x8xf32>
    %102 = arith.cmpf oge, %100, %101 : vector<16x8xf32>
    %cst_52 = arith.constant 2.000000e-01 : f32
    %103 = vector.broadcast %cst_52 : f32 to vector<16x8xf32>
    %104 = arith.mulf %103, %100 : vector<16x8xf32>
    %105 = arith.select %102, %100, %104 : vector<16x8xi1>, vector<16x8xf32>
    %106 = tpu.iota {dimensions = array<i32: 0>} : vector<16x8xi32>
    %107 = tpu.iota {dimensions = array<i32: 1>} : vector<16x8xi32>
    %cst_53 = arith.constant 0.000000e+00 : f32
    %108 = vector.broadcast %cst_53 : f32 to vector<16x8xf32>
    %c0_i32 = arith.constant 0 : i32
    %109 = vector.broadcast %c0_i32 : i32 to vector<16x8xi32>
    %110 = arith.addi %107, %109 : vector<16x8xi32>
    %111 = arith.cmpi eq, %106, %110 : vector<16x8xi32>
    %112 = arith.extui %111 : vector<16x8xi1> to vector<16x8xi32>
    %113 = arith.sitofp %112 : vector<16x8xi32> to vector<16x8xf32>
    %114 = arith.addf %108, %113 : vector<16x8xf32>
    %c8_i32 = arith.constant 8 : i32
    %115 = vector.broadcast %c8_i32 : i32 to vector<16x8xi32>
    %116 = arith.addi %107, %115 : vector<16x8xi32>
    %117 = arith.cmpi eq, %106, %116 : vector<16x8xi32>
    %118 = arith.extui %117 : vector<16x8xi1> to vector<16x8xi32>
    %119 = arith.sitofp %118 : vector<16x8xi32> to vector<16x8xf32>
    %120 = arith.addf %114, %119 : vector<16x8xf32>
    %cst_54 = arith.constant dense<0.000000e+00> : vector<16xf32>
    %121 = vector.multi_reduction <add>, %105, %cst_54 [1] : vector<16x8xf32> to vector<16xf32>
    %122 = vector.shape_cast %121 : vector<16xf32> to vector<16x1xf32>
    %123 = vector.broadcast %122 : vector<16x1xf32> to vector<16x8xf32>
    %124 = arith.mulf %120, %123 : vector<16x8xf32>
    %cst_55 = arith.constant dense<0.000000e+00> : vector<8xf32>
    %125 = vector.multi_reduction <add>, %124, %cst_55 [0] : vector<16x8xf32> to vector<8xf32>
    %126 = vector.shape_cast %125 : vector<8xf32> to vector<1x8xf32>
    %cst_56 = arith.constant 6.250000e-02 : f32
    %127 = vector.broadcast %cst_56 : f32 to vector<1x8xf32>
    %128 = arith.mulf %126, %127 : vector<1x8xf32>
    %129 = vector.broadcast %128 : vector<1x8xf32> to vector<16x8xf32>
    %130 = arith.mulf %120, %129 : vector<16x8xf32>
    %cst_57 = arith.constant dense<0.000000e+00> : vector<16xf32>
    %131 = vector.multi_reduction <add>, %130, %cst_57 [1] : vector<16x8xf32> to vector<16xf32>
    %132 = vector.shape_cast %131 : vector<16xf32> to vector<16x1xf32>
    %133 = vector.broadcast %132 : vector<16x1xf32> to vector<16x8xf32>
    %134 = arith.subf %105, %133 : vector<16x8xf32>
    %135 = arith.mulf %134, %134 : vector<16x8xf32>
    %cst_58 = arith.constant dense<0.000000e+00> : vector<16xf32>
    %136 = vector.multi_reduction <add>, %135, %cst_58 [1] : vector<16x8xf32> to vector<16xf32>
    %137 = vector.shape_cast %136 : vector<16xf32> to vector<16x1xf32>
    %138 = vector.broadcast %137 : vector<16x1xf32> to vector<16x8xf32>
    %139 = arith.mulf %120, %138 : vector<16x8xf32>
    %cst_59 = arith.constant dense<0.000000e+00> : vector<8xf32>
    %140 = vector.multi_reduction <add>, %139, %cst_59 [0] : vector<16x8xf32> to vector<8xf32>
    %141 = vector.shape_cast %140 : vector<8xf32> to vector<1x8xf32>
    %cst_60 = arith.constant 6.250000e-02 : f32
    %142 = vector.broadcast %cst_60 : f32 to vector<1x8xf32>
    %143 = arith.mulf %141, %142 : vector<1x8xf32>
    %cst_61 = arith.constant 9.99999974E-6 : f32
    %144 = vector.broadcast %cst_61 : f32 to vector<1x8xf32>
    %145 = arith.addf %143, %144 : vector<1x8xf32>
    %146 = math.rsqrt %145 : vector<1x8xf32>
    %c0_62 = arith.constant 0 : index
    %c0_63 = arith.constant 0 : index
    %147 = vector.load %arg16[%c0_62, %c0_63] : memref<1x8xf32, #tpu.memory_space<vmem>>, vector<1x8xf32>
    %148 = arith.mulf %146, %147 : vector<1x8xf32>
    %149 = vector.broadcast %148 : vector<1x8xf32> to vector<16x8xf32>
    %150 = arith.mulf %120, %149 : vector<16x8xf32>
    %cst_64 = arith.constant dense<0.000000e+00> : vector<16xf32>
    %151 = vector.multi_reduction <add>, %150, %cst_64 [1] : vector<16x8xf32> to vector<16xf32>
    %152 = vector.shape_cast %151 : vector<16xf32> to vector<16x1xf32>
    %153 = vector.broadcast %152 : vector<16x1xf32> to vector<16x8xf32>
    %154 = arith.mulf %134, %153 : vector<16x8xf32>
    %cst_65 = arith.constant 0.000000e+00 : f32
    %155 = vector.broadcast %cst_65 : f32 to vector<16x256xf32>
    %156 = vector.extract_strided_slice %154 {offsets = [0, 0], sizes = [16, 1], strides = [1, 1]} : vector<16x8xf32> to vector<16x1xf32>
    %157 = vector.broadcast %156 : vector<16x1xf32> to vector<16x8xf32>
    %158 = arith.mulf %157, %120 : vector<16x8xf32>
    %c0_66 = arith.constant 0 : index
    %c0_67 = arith.constant 0 : index
    %c0_68 = arith.constant 0 : index
    %159 = vector.load %arg17[%c0_66, %c0_67, %c0_68] : memref<8x8x256xbf16, #tpu.memory_space<vmem>>, vector<1x8x256xbf16>
    %160 = vector.shape_cast %159 : vector<1x8x256xbf16> to vector<8x256xbf16>
    %161 = arith.truncf %158 : vector<16x8xf32> to vector<16x8xbf16>
    %cst_69 = arith.constant dense<0.000000e+00> : vector<16x256xf32>
    %162 = tpu.matmul %161, %160, %cst_69 {dimension_numbers = #tpu.dot_dimension_numbers<[1], [0], [0], [1], [0, 0, 1, 1], [], []>} : vector<16x8xbf16>, vector<8x256xbf16>, vector<16x256xf32> -> vector<16x256xf32>
    %163 = arith.addf %155, %162 : vector<16x256xf32>
    %164 = vector.extract_strided_slice %154 {offsets = [0, 1], sizes = [16, 1], strides = [1, 1]} : vector<16x8xf32> to vector<16x1xf32>
    %165 = vector.broadcast %164 : vector<16x1xf32> to vector<16x8xf32>
    %166 = arith.mulf %165, %120 : vector<16x8xf32>
    %c1 = arith.constant 1 : index
    %c0_70 = arith.constant 0 : index
    %c0_71 = arith.constant 0 : index
    %167 = vector.load %arg17[%c1, %c0_70, %c0_71] : memref<8x8x256xbf16, #tpu.memory_space<vmem>>, vector<1x8x256xbf16>
    %168 = vector.shape_cast %167 : vector<1x8x256xbf16> to vector<8x256xbf16>
    %169 = arith.truncf %166 : vector<16x8xf32> to vector<16x8xbf16>
    %cst_72 = arith.constant dense<0.000000e+00> : vector<16x256xf32>
    %170 = tpu.matmul %169, %168, %cst_72 {dimension_numbers = #tpu.dot_dimension_numbers<[1], [0], [0], [1], [0, 0, 1, 1], [], []>} : vector<16x8xbf16>, vector<8x256xbf16>, vector<16x256xf32> -> vector<16x256xf32>
    %171 = arith.addf %163, %170 : vector<16x256xf32>
    %172 = vector.extract_strided_slice %154 {offsets = [0, 2], sizes = [16, 1], strides = [1, 1]} : vector<16x8xf32> to vector<16x1xf32>
    %173 = vector.broadcast %172 : vector<16x1xf32> to vector<16x8xf32>
    %174 = arith.mulf %173, %120 : vector<16x8xf32>
    %c2 = arith.constant 2 : index
    %c0_73 = arith.constant 0 : index
    %c0_74 = arith.constant 0 : index
    %175 = vector.load %arg17[%c2, %c0_73, %c0_74] : memref<8x8x256xbf16, #tpu.memory_space<vmem>>, vector<1x8x256xbf16>
    %176 = vector.shape_cast %175 : vector<1x8x256xbf16> to vector<8x256xbf16>
    %177 = arith.truncf %174 : vector<16x8xf32> to vector<16x8xbf16>
    %cst_75 = arith.constant dense<0.000000e+00> : vector<16x256xf32>
    %178 = tpu.matmul %177, %176, %cst_75 {dimension_numbers = #tpu.dot_dimension_numbers<[1], [0], [0], [1], [0, 0, 1, 1], [], []>} : vector<16x8xbf16>, vector<8x256xbf16>, vector<16x256xf32> -> vector<16x256xf32>
    %179 = arith.addf %171, %178 : vector<16x256xf32>
    %180 = vector.extract_strided_slice %154 {offsets = [0, 3], sizes = [16, 1], strides = [1, 1]} : vector<16x8xf32> to vector<16x1xf32>
    %181 = vector.broadcast %180 : vector<16x1xf32> to vector<16x8xf32>
    %182 = arith.mulf %181, %120 : vector<16x8xf32>
    %c3 = arith.constant 3 : index
    %c0_76 = arith.constant 0 : index
    %c0_77 = arith.constant 0 : index
    %183 = vector.load %arg17[%c3, %c0_76, %c0_77] : memref<8x8x256xbf16, #tpu.memory_space<vmem>>, vector<1x8x256xbf16>
    %184 = vector.shape_cast %183 : vector<1x8x256xbf16> to vector<8x256xbf16>
    %185 = arith.truncf %182 : vector<16x8xf32> to vector<16x8xbf16>
    %cst_78 = arith.constant dense<0.000000e+00> : vector<16x256xf32>
    %186 = tpu.matmul %185, %184, %cst_78 {dimension_numbers = #tpu.dot_dimension_numbers<[1], [0], [0], [1], [0, 0, 1, 1], [], []>} : vector<16x8xbf16>, vector<8x256xbf16>, vector<16x256xf32> -> vector<16x256xf32>
    %187 = arith.addf %179, %186 : vector<16x256xf32>
    %188 = vector.extract_strided_slice %154 {offsets = [0, 4], sizes = [16, 1], strides = [1, 1]} : vector<16x8xf32> to vector<16x1xf32>
    %189 = vector.broadcast %188 : vector<16x1xf32> to vector<16x8xf32>
    %190 = arith.mulf %189, %120 : vector<16x8xf32>
    %c4 = arith.constant 4 : index
    %c0_79 = arith.constant 0 : index
    %c0_80 = arith.constant 0 : index
    %191 = vector.load %arg17[%c4, %c0_79, %c0_80] : memref<8x8x256xbf16, #tpu.memory_space<vmem>>, vector<1x8x256xbf16>
    %192 = vector.shape_cast %191 : vector<1x8x256xbf16> to vector<8x256xbf16>
    %193 = arith.truncf %190 : vector<16x8xf32> to vector<16x8xbf16>
    %cst_81 = arith.constant dense<0.000000e+00> : vector<16x256xf32>
    %194 = tpu.matmul %193, %192, %cst_81 {dimension_numbers = #tpu.dot_dimension_numbers<[1], [0], [0], [1], [0, 0, 1, 1], [], []>} : vector<16x8xbf16>, vector<8x256xbf16>, vector<16x256xf32> -> vector<16x256xf32>
    %195 = arith.addf %187, %194 : vector<16x256xf32>
    %196 = vector.extract_strided_slice %154 {offsets = [0, 5], sizes = [16, 1], strides = [1, 1]} : vector<16x8xf32> to vector<16x1xf32>
    %197 = vector.broadcast %196 : vector<16x1xf32> to vector<16x8xf32>
    %198 = arith.mulf %197, %120 : vector<16x8xf32>
    %c5 = arith.constant 5 : index
    %c0_82 = arith.constant 0 : index
    %c0_83 = arith.constant 0 : index
    %199 = vector.load %arg17[%c5, %c0_82, %c0_83] : memref<8x8x256xbf16, #tpu.memory_space<vmem>>, vector<1x8x256xbf16>
    %200 = vector.shape_cast %199 : vector<1x8x256xbf16> to vector<8x256xbf16>
    %201 = arith.truncf %198 : vector<16x8xf32> to vector<16x8xbf16>
    %cst_84 = arith.constant dense<0.000000e+00> : vector<16x256xf32>
    %202 = tpu.matmul %201, %200, %cst_84 {dimension_numbers = #tpu.dot_dimension_numbers<[1], [0], [0], [1], [0, 0, 1, 1], [], []>} : vector<16x8xbf16>, vector<8x256xbf16>, vector<16x256xf32> -> vector<16x256xf32>
    %203 = arith.addf %195, %202 : vector<16x256xf32>
    %204 = vector.extract_strided_slice %154 {offsets = [0, 6], sizes = [16, 1], strides = [1, 1]} : vector<16x8xf32> to vector<16x1xf32>
    %205 = vector.broadcast %204 : vector<16x1xf32> to vector<16x8xf32>
    %206 = arith.mulf %205, %120 : vector<16x8xf32>
    %c6 = arith.constant 6 : index
    %c0_85 = arith.constant 0 : index
    %c0_86 = arith.constant 0 : index
    %207 = vector.load %arg17[%c6, %c0_85, %c0_86] : memref<8x8x256xbf16, #tpu.memory_space<vmem>>, vector<1x8x256xbf16>
    %208 = vector.shape_cast %207 : vector<1x8x256xbf16> to vector<8x256xbf16>
    %209 = arith.truncf %206 : vector<16x8xf32> to vector<16x8xbf16>
    %cst_87 = arith.constant dense<0.000000e+00> : vector<16x256xf32>
    %210 = tpu.matmul %209, %208, %cst_87 {dimension_numbers = #tpu.dot_dimension_numbers<[1], [0], [0], [1], [0, 0, 1, 1], [], []>} : vector<16x8xbf16>, vector<8x256xbf16>, vector<16x256xf32> -> vector<16x256xf32>
    %211 = arith.addf %203, %210 : vector<16x256xf32>
    %212 = vector.extract_strided_slice %154 {offsets = [0, 7], sizes = [16, 1], strides = [1, 1]} : vector<16x8xf32> to vector<16x1xf32>
    %213 = vector.broadcast %212 : vector<16x1xf32> to vector<16x8xf32>
    %214 = arith.mulf %213, %120 : vector<16x8xf32>
    %c7 = arith.constant 7 : index
    %c0_88 = arith.constant 0 : index
    %c0_89 = arith.constant 0 : index
    %215 = vector.load %arg17[%c7, %c0_88, %c0_89] : memref<8x8x256xbf16, #tpu.memory_space<vmem>>, vector<1x8x256xbf16>
    %216 = vector.shape_cast %215 : vector<1x8x256xbf16> to vector<8x256xbf16>
    %217 = arith.truncf %214 : vector<16x8xf32> to vector<16x8xbf16>
    %cst_90 = arith.constant dense<0.000000e+00> : vector<16x256xf32>
    %218 = tpu.matmul %217, %216, %cst_90 {dimension_numbers = #tpu.dot_dimension_numbers<[1], [0], [0], [1], [0, 0, 1, 1], [], []>} : vector<16x8xbf16>, vector<8x256xbf16>, vector<16x256xf32> -> vector<16x256xf32>
    %219 = arith.addf %211, %218 : vector<16x256xf32>
    %220 = tpu.iota {dimensions = array<i32: 0>} : vector<2x16xi32>
    %221 = tpu.iota {dimensions = array<i32: 1>} : vector<2x16xi32>
    %c8_i32_91 = arith.constant 8 : i32
    %222 = vector.broadcast %c8_i32_91 : i32 to vector<2x16xi32>
    %223 = arith.muli %220, %222 : vector<2x16xi32>
    %224 = arith.cmpi sge, %221, %223 : vector<2x16xi32>
    %c8_i32_92 = arith.constant 8 : i32
    %225 = vector.broadcast %c8_i32_92 : i32 to vector<2x16xi32>
    %226 = arith.addi %223, %225 : vector<2x16xi32>
    %227 = arith.cmpi slt, %221, %226 : vector<2x16xi32>
    %228 = arith.andi %224, %227 : vector<2x16xi1>
    %229 = arith.extui %228 : vector<2x16xi1> to vector<2x16xi32>
    %230 = arith.sitofp %229 : vector<2x16xi32> to vector<2x16xf32>
    %231 = arith.truncf %230 : vector<2x16xf32> to vector<2x16xbf16>
    %232 = arith.truncf %219 : vector<16x256xf32> to vector<16x256xbf16>
    %cst_93 = arith.constant dense<0.000000e+00> : vector<2x256xf32>
    %233 = tpu.matmul %231, %232, %cst_93 {dimension_numbers = #tpu.dot_dimension_numbers<[1], [0], [0], [1], [0, 0, 1, 1], [], []>} : vector<2x16xbf16>, vector<16x256xbf16>, vector<2x256xf32> -> vector<2x256xf32>
    %c0_94 = arith.constant 0 : index
    %c0_95 = arith.constant 0 : index
    %234 = vector.load %arg18[%c0_94, %c0_95] : memref<1x256xf32, #tpu.memory_space<vmem>>, vector<1x256xf32>
    %235 = vector.broadcast %234 : vector<1x256xf32> to vector<2x256xf32>
    %236 = arith.addf %233, %235 : vector<2x256xf32>
    %cst_96 = arith.constant 0.000000e+00 : f32
    %237 = vector.broadcast %cst_96 : f32 to vector<2x256xf32>
    %238 = arith.cmpf oge, %236, %237 : vector<2x256xf32>
    %cst_97 = arith.constant 2.000000e-01 : f32
    %239 = vector.broadcast %cst_97 : f32 to vector<2x256xf32>
    %240 = arith.mulf %239, %236 : vector<2x256xf32>
    %241 = arith.select %238, %236, %240 : vector<2x256xi1>, vector<2x256xf32>
    %c0_98 = arith.constant 0 : index
    %c0_99 = arith.constant 0 : index
    %242 = vector.load %arg19[%c0_98, %c0_99] : memref<256x32xbf16, #tpu.memory_space<vmem>>, vector<256x32xbf16>
    %243 = arith.truncf %241 : vector<2x256xf32> to vector<2x256xbf16>
    %cst_100 = arith.constant dense<0.000000e+00> : vector<2x32xf32>
    %244 = tpu.matmul %243, %242, %cst_100 {dimension_numbers = #tpu.dot_dimension_numbers<[1], [0], [0], [1], [0, 0, 1, 1], [], []>} : vector<2x256xbf16>, vector<256x32xbf16>, vector<2x32xf32> -> vector<2x32xf32>
    %c0_101 = arith.constant 0 : index
    %c0_102 = arith.constant 0 : index
    %245 = vector.load %arg20[%c0_101, %c0_102] : memref<1x32xf32, #tpu.memory_space<vmem>>, vector<1x32xf32>
    %246 = vector.broadcast %245 : vector<1x32xf32> to vector<2x32xf32>
    %247 = arith.addf %244, %246 : vector<2x32xf32>
    %cst_103 = arith.constant 0.000000e+00 : f32
    %248 = vector.broadcast %cst_103 : f32 to vector<2x32xf32>
    %249 = arith.cmpf oge, %247, %248 : vector<2x32xf32>
    %cst_104 = arith.constant 2.000000e-01 : f32
    %250 = vector.broadcast %cst_104 : f32 to vector<2x32xf32>
    %251 = arith.mulf %250, %247 : vector<2x32xf32>
    %252 = arith.select %249, %247, %251 : vector<2x32xi1>, vector<2x32xf32>
    %c0_105 = arith.constant 0 : index
    %c0_106 = arith.constant 0 : index
    %253 = vector.load %arg21[%c0_105, %c0_106] : memref<32x2xbf16, #tpu.memory_space<vmem>>, vector<32x2xbf16>
    %254 = arith.truncf %252 : vector<2x32xf32> to vector<2x32xbf16>
    %cst_107 = arith.constant dense<0.000000e+00> : vector<2x2xf32>
    %255 = tpu.matmul %254, %253, %cst_107 {dimension_numbers = #tpu.dot_dimension_numbers<[1], [0], [0], [1], [0, 0, 1, 1], [], []>} : vector<2x32xbf16>, vector<32x2xbf16>, vector<2x2xf32> -> vector<2x2xf32>
    %c0_108 = arith.constant 0 : index
    %c0_109 = arith.constant 0 : index
    %256 = vector.load %arg22[%c0_108, %c0_109] : memref<1x2xf32, #tpu.memory_space<vmem>>, vector<1x2xf32>
    %257 = vector.broadcast %256 : vector<1x2xf32> to vector<2x2xf32>
    %258 = arith.addf %255, %257 : vector<2x2xf32>
    %c0_110 = arith.constant 0 : index
    %c0_111 = arith.constant 0 : index
    %259 = vector.load %arg23[%c0_110, %c0_111] : memref<2x2xf32, #tpu.memory_space<vmem>>, vector<2x2xf32>
    tpu.vector_store %arg23[%c0_110, %c0_111], %258 {strides = array<i32>} : memref<2x2xf32, #tpu.memory_space<vmem>>, vector<2x2xf32>,
    return
  }
}

</mosaic_0001>

<bundles_post_ra>
// kernel: gnn_predictor_forward.1
= control target key start
LH: loop header
LB: loop body
LE: loop exit
PB: predicated region body
PF: predicated region fallthrough
CT: control target
= control target key end

     0   :  { %s2259_s0 = inlined_call_operand.vmem [shape: f32[16,1], index: 0, kind: input, shape index: {}]   ;;  %s2260_s1 = inlined_call_operand.vmem [shape: f32[16,8], index: 1, kind: input, shape index: {}]   ;;  %s2261_s2 = inlined_call_operand.vmem [shape: bf16[8,8], index: 2, kind: input, shape index: {}]   ;;  %s2262_s3 = inlined_call_operand.vmem [shape: f32[1,8], index: 3, kind: input, shape index: {}]   ;;  %s2263_s4 = inlined_call_operand.vmem [shape: bf16[8,8], index: 4, kind: input, shape index: {}]   ;;  %s2264_s5 = inlined_call_operand.vmem [shape: f32[1,8], index: 5, kind: input, shape index: {}]   ;;  %s2265_s6 = inlined_call_operand.vmem [shape: f32[1,8], index: 6, kind: input, shape index: {}]   ;;  %s2266_s7 = inlined_call_operand.vmem [shape: f32[1,8], index: 7, kind: input, shape index: {}]   ;;  %s2267_s8 = inlined_call_operand.vmem [shape: bf16[8,8], index: 8, kind: input, shape index: {}]   ;;  %s2268_s9 = inlined_call_operand.vmem [shape: f32[1,8], index: 9, kind: input, shape index: {}]   ;;  %s2269_s10 = inlined_call_operand.vmem [shape: f32[1,8], index: 10, kind: input, shape index: {}]   ;;  %s2270_s11 = inlined_call_operand.vmem [shape: f32[1,8], index: 11, kind: input, shape index: {}]   ;;  %s2271_s12 = inlined_call_operand.vmem [shape: bf16[8,64], index: 12, kind: input, shape index: {}]   ;;  %s2272_s13 = inlined_call_operand.vmem [shape: f32[1,64], index: 13, kind: input, shape index: {}]   ;;  %s2273_s14 = inlined_call_operand.vmem [shape: bf16[64,8], index: 14, kind: input, shape index: {}]   ;;  %s2274_s15 = inlined_call_operand.vmem [shape: f32[1,8], index: 15, kind: input, shape index: {}]   ;;  %s2275_s16 = inlined_call_operand.vmem [shape: f32[1,8], index: 16, kind: input, shape index: {}]   ;;  %s2276_s17 = inlined_call_operand.vmem [shape: bf16[8,8,256], index: 17, kind: input, shape index: {}]   ;;  %s2277_s18 = inlined_call_operand.vmem [shape: f32[1,256], index: 18, kind: input, shape index: {}]   ;;  %s2278_s19 = inlined_call_operand.vmem [shape: bf16[256,32], index: 19, kind: input, shape index: {}]   ;;  %s2279_s20 = inlined_call_operand.vmem [shape: f32[1,32], index: 20, kind: input, shape index: {}]   ;;  %s2280_s21 = inlined_call_operand.vmem [shape: bf16[32,2], index: 21, kind: input, shape index: {}]   ;;  %s2281_s22 = inlined_call_operand.vmem [shape: f32[1,2], index: 22, kind: input, shape index: {}]   ;;  %s2282_s23 = inlined_call_operand.hbm [shape: f32[2,2], index: 23, kind: output, shape index: {}]  }
   0x1   :  { %2285 = sst [smem:[#allocation5_spill]] %s2259_s0 }
   0x2   :  { %2286 = sst [smem:[#allocation6_spill]] %s2260_s1 }
   0x3   :  { %2287 = sst [smem:[#allocation7_spill]] %s2261_s2 }
   0x4   :  { %2288 = sst [smem:[#allocation8_spill]] %s2262_s3 }
   0x5   :  { %2289 = sst [smem:[#allocation9_spill]] %s2263_s4 }
   0x6   :  { %2290 = sst [smem:[#allocation10_spill]] %s2264_s5 }
   0x7   :  { %2291 = sst [smem:[#allocation11_spill]] %s2265_s6 }
   0x8   :  { %2292 = sst [smem:[#allocation12_spill]] %s2266_s7 }
   0x9   :  { %s2293_s24 = sld [smem:[#allocation5_spill]]  ;;  %v1818_v1 = vmov 0   ;;  %s2294_s2 = sld [smem:[#allocation7_spill]]  ;;  %vm105_vm0 = vcmask 1043456   ;;  %v1819_v4 = vmov 0.0   ;;  %vm1820_vm1 = vmmov 0  }
   0xa   :  { %1738 = vset.pattern.permute.xlu0 %v1818_v1  ;;  %1655 = vmatprep.subr.bf16.mxu0 %v1819_v4 }
   0xb   :  { %1661 = vmatprep.subr.bf16.mxu1 %v1819_v4  ;;  %1657 = vmatprep.mubr.msk.bf16.mxu0 %vm1820_vm1, %v1819_v4 }
   0xc   :  { %1663 = vmatprep.mubr.msk.bf16.mxu1 %vm1820_vm1, %v1819_v4 }
   0xf   :  { %v76_v0 = vld [vmem:[%s2293_s24] sm:$0xff]  ;;  %v77_v2 = vld [vmem:[%s2293_s24 + $0x8] sm:$0xff] }
  0x10   :  { %82 = vperm.xlu0 %1738, %v76_v0   ;;  %v92_v3 = vld [vmem:[%s2294_s2] sm:$0xf] }
  0x11   :  { %v107_v5 = vsel %vm105_vm0, %v92_v3, 0 }
  0x12   :  { %1656 = vmatpush3.bf16.msra.mxu0 %v107_v5 }
  0x13   :  { %1667 = vmatprep.subr.bf16.mxu0 %v1819_v4 }
  0x14   :  { %87 = vperm.xlu0 %1738, %v77_v2  }
  0x15   :  { %28 = vsyncpa [#allocation3], 0  ;;  %s2295_s7 = sld [smem:[#allocation6_spill]]  ;;  %vm101_vm2 = vcmask 64512   ;;  %s2296_s4 = sld [smem:[#allocation9_spill]]  ;;  %vm473_vm9 = vcmask 523264  }
  0x16   :  { %s2297_s25 = sld [smem:[#allocation8_spill]]  ;;  %v261_v27 = vld [vmem:[%s2267_s8] sm:$0xf]  ;;  %s2298_s6 = sld [smem:[#allocation10_spill]] }
  0x17   :  { %v274_v28 = vsel %vm105_vm0, %v261_v27, 0  ;;  %s2300_s3 = sld [smem:[#allocation12_spill]] }
  0x1b   :  { %v78_v7 = vld [vmem:[%s2295_s7] sm:$0xff]  ;;  %v79_v8 = vld [vmem:[%s2295_s7 + $0x8] sm:$0xff]  ;;  %s2299_s7 = sld [smem:[#allocation11_spill]] }
  0x1c   :  { %v156_v13 = vld [vmem:[%s2296_s4] sm:$0xf] }
  0x1d   :  { %v169_v14 = vsel %vm105_vm0, %v156_v13, 0  ;;  %v1534_v15 = vld [vmem:[%s2297_s25] ss:$0 sm:$0xff] }
  0x1e   :  { %1662 = vmatpush3.bf16.msra.mxu1 %v169_v14  ;;  %v1536_v29 = vld [vmem:[%s2298_s6] ss:$0 sm:$0xff] }
  0x1f   :  { %1673 = vmatprep.subr.bf16.mxu1 %v1819_v4  ;;  %v1539_v2 = vld [vmem:[%s2300_s3] ss:$0 sm:$0xff] }
  0x20   :  { %v371_v13 = vld [vmem:[%s2271_s12] sm:$0xf] }
  0x21   :  { %v1538_v62 = vld [vmem:[%s2299_s7] ss:$0 sm:$0xff]  ;;  %v384_v14 = vsel %vm105_vm0, %v371_v13, 0 }
  0x8f   :  { %v1967_v6 = vpop.permute.xlu0 %82 }
  0x90   :  { %v90_v10 = vmul.f32 %v1967_v6, %v78_v7 }
  0x93   :  { %v1975_v9 = vpop.permute.xlu0 %87 }
  0x94   :  { %v91_v11 = vmul.f32 %v1975_v9, %v79_v8 }
  0x96   :  { %v93_v12 = vpack.c.bf16 %v91_v11, %v90_v10 }
  0x98   :  { %1658 = vmatmul.mubr.msk.bf16.vlgmr.msra.gmra.mrb[0].mxu0 %vm101_vm2, %v93_v12 }
  0x99   :  { %1669 = vmatprep.mubr.msk.bf16.mxu0 %vm1820_vm1, %v1819_v4  ;;  %1668 = vmatpush3.bf16.msra.mxu0 %v274_v28 }
  0x9a   :  { %1679 = vmatprep.subr.bf16.mxu0 %v1819_v4 }
 0x16b   :  { %v143_v16 = vpop.f32.mrb[0].mxu0 }
 0x16c   :  { %v144_v17 = vadd.f32 %v1534_v15, %v143_v16  ;;  %v1659_v18 = vpop.f32.mrb[1].mxu0  ;;  %v1751_v16 = vld [vmem:[%s2273_s14 + $0x8] sm:$0xff]  }
 0x16d   :  { %v146_v19 = vpop.f32.mrb[2].mxu0 }
 0x16e   :  { %v152_v20 = vmul.f32 0.2, %v144_v17  ;;  %v147_v21 = vadd.f32 %v1534_v15, %v146_v19  ;;  %v1660_v22 = vpop.f32.mrb[3].mxu0  ;;  %vm150_vm3 = vcmp.ge.f32.partialorder %v144_v17, 0.0  ;;  %v1750_v15 = vld [vmem:[%s2273_s14] sm:$0xff]  }
 0x170   :  { %vm151_vm4 = vcmp.ge.f32.partialorder %v147_v21, 0.0  ;;  %v153_v23 = vmul.f32 0.2, %v147_v21  ;;  %v154_v24 = vsel %vm150_vm3, %v144_v17, %v152_v20  ;;  %v1540_v17 = vld [vmem:[%s2268_s9] ss:$0 sm:$0xff] }
 0x172   :  { %v155_v25 = vsel %vm151_vm4, %v147_v21, %v153_v23 }
 0x173   :  { %v157_v26 = vpack.c.bf16 %v155_v25, %v154_v24 }
 0x175   :  { %1664 = vmatmul.mubr.msk.bf16.vlgmr.msra.gmra.mrb[0].mxu1 %vm101_vm2, %v157_v26 }
 0x176   :  { %1675 = vmatprep.mubr.msk.bf16.mxu1 %vm1820_vm1, %v1819_v4  ;;  %1674 = vmatpush3.bf16.msra.mxu1 %v384_v14 }
 0x248   :  { %v205_v30 = vpop.f32.mrb[0].mxu1 }
 0x249   :  { %v206_v31 = vadd.f32 %v1536_v29, %v205_v30  ;;  %v1665_v32 = vpop.f32.mrb[1].mxu1 }
 0x24a   :  { %v208_v33 = vpop.f32.mrb[2].mxu1 }
 0x24b   :  { %v209_v34 = vadd.f32 %v1536_v29, %v208_v33  ;;  %v1666_v35 = vpop.f32.mrb[3].mxu1  ;;  %v214_v36 = vsel %vm101_vm2, %v206_v31, 0.0 }
 0x24d   :  { %v215_v37 = vsel %vm101_vm2, %v209_v34, 0.0 }
 0x24e   :  { %v216_v38 = vadd.f32 %v215_v37, %v214_v36 }
 0x250   :  { %v217_v39 = vrot.slane %v216_v38, 4 }
 0x252   :  { %v218_v40 = vadd.f32 %v217_v39, %v216_v38 }
 0x254   :  { %v219_v41 = vrot.slane %v218_v40, 2 }
 0x256   :  { %v220_v42 = vadd.f32 %v219_v41, %v218_v40 }
 0x258   :  { %v221_v43 = vrot.slane %v220_v42, 1 }
 0x25a   :  { %v222_v44 = vadd.f32 %v221_v43, %v220_v42 }
 0x25c   :  { %v224_v45 = vmul.f32 0.0625, %v222_v44 }
 0x25e   :  { %v225_v46 = vsub.f32 %v206_v31, %v224_v45  ;;  %v226_v47 = vsub.f32 %v209_v34, %v224_v45 }
 0x260   :  { %v227_v48 = vmul.f32 %v225_v46, %v225_v46  ;;  %v228_v49 = vmul.f32 %v226_v47, %v226_v47 }
 0x262   :  { %v229_v50 = vsel %vm101_vm2, %v227_v48, 0.0  ;;  %v230_v51 = vsel %vm101_vm2, %v228_v49, 0.0 }
 0x263   :  { %v231_v52 = vadd.f32 %v230_v51, %v229_v50 }
 0x265   :  { %v232_v53 = vrot.slane %v231_v52, 4 }
 0x267   :  { %v233_v54 = vadd.f32 %v232_v53, %v231_v52 }
 0x269   :  { %v234_v55 = vrot.slane %v233_v54, 2 }
 0x26b   :  { %v235_v56 = vadd.f32 %v234_v55, %v233_v54  ;;  %v1542_v54 = vld [vmem:[%s2269_s10] ss:$0 sm:$0xff] }
 0x26d   :  { %v236_v57 = vrot.slane %v235_v56, 1 }
 0x26f   :  { %v237_v58 = vadd.f32 %v236_v57, %v235_v56  ;;  %v1543_v57 = vld [vmem:[%s2270_s11] ss:$0 sm:$0xff] }
 0x271   :  { %v238_v59 = vmul.f32 0.0625, %v237_v58 }
 0x273   :  { %v239_v60 = vadd.f32 1e-05, %v238_v59 }
 0x275   :  { %1788 = vrsqrt.f32 %v239_v60 }
 0x27f   :  { %v1789_v61 = vpop.eup %1788 }
 0x280   :  { %v241_v63 = vmul.f32 %v1789_v61, %v225_v46  ;;  %v242_v0 = vmul.f32 %v1789_v61, %v226_v47 }
 0x282   :  { %v249_v3 = vmul.f32 %v1538_v62, %v241_v63  ;;  %v250_v5 = vmul.f32 %v1538_v62, %v242_v0 }
 0x284   :  { %v257_v7 = vadd.f32 %v1539_v2, %v249_v3  ;;  %v258_v8 = vadd.f32 %v1539_v2, %v250_v5  ;;  %v1752_v2 = vld [vmem:[%s2273_s14 + $0x10] sm:$0xff]   ;;  %v1753_v3 = vld [vmem:[%s2273_s14 + $0x18] sm:$0xff]  }
 0x286   :  { %v259_v10 = vmul.f32 %v257_v7, %v1967_v6  ;;  %v260_v11 = vmul.f32 %v258_v8, %v1975_v9 }
 0x288   :  { %v262_v12 = vpack.c.bf16 %v260_v11, %v259_v10 }
 0x28a   :  { %1670 = vmatmul.mubr.msk.bf16.vlgmr.msra.gmra.mrb[4].mxu0 %vm101_vm2, %v262_v12 }
 0x28b   :  { %1687 = vmatprep.mubr.msk.bf16.mxu0 %vm1820_vm1, %v1819_v4  ;;  %1680 = vmatpush3.bf16.msra.mxu0 %v1750_v15 }
 0x28c   :  { %1681 = vmatprep.subr.bf16.mxu0 %v1819_v4 }
 0x28f   :  { %1682 = vmatpush3.bf16.msra.mxu0 %v1751_v16 }
 0x290   :  { %1683 = vmatprep.subr.bf16.mxu0 %v1819_v4 }
 0x293   :  { %1684 = vmatpush3.bf16.msra.mxu0 %v1752_v2 }
 0x294   :  { %1685 = vmatprep.subr.bf16.mxu0 %v1819_v4 }
 0x297   :  { %1686 = vmatpush3.bf16.msra.mxu0 %v1753_v3 }
 0x35d   :  { %v310_v18 = vpop.f32.mrb[4].mxu0 }
 0x35e   :  { %v311_v19 = vadd.f32 %v1540_v17, %v310_v18  ;;  %v1671_v20 = vpop.f32.mrb[5].mxu0 }
 0x35f   :  { %v313_v21 = vpop.f32.mrb[6].mxu0 }
 0x360   :  { %vm317_vm5 = vcmp.ge.f32.partialorder %v311_v19, 0.0  ;;  %v319_v22 = vmul.f32 0.2, %v311_v19  ;;  %v314_v23 = vadd.f32 %v1540_v17, %v313_v21  ;;  %v1672_v24 = vpop.f32.mrb[7].mxu0  ;;  %v1546_v17 = vld [vmem:[%s2274_s15] ss:$0 sm:$0xff] }
 0x362   :  { %v321_v25 = vsel %vm317_vm5, %v311_v19, %v319_v22  ;;  %vm318_vm6 = vcmp.ge.f32.partialorder %v314_v23, 0.0  ;;  %v320_v26 = vmul.f32 0.2, %v314_v23 }
 0x363   :  { %v325_v28 = vsel %vm101_vm2, %v321_v25, 0.0 }
 0x364   :  { %v322_v27 = vsel %vm318_vm6, %v314_v23, %v320_v26  ;;  %vm1474_vm6 = vcmask 261120  }
 0x365   :  { %v326_v29 = vsel %vm101_vm2, %v322_v27, 0.0 }
 0x366   :  { %v327_v30 = vadd.f32 %v326_v29, %v325_v28 }
 0x368   :  { %v328_v31 = vrot.slane %v327_v30, 4 }
 0x36a   :  { %v329_v32 = vadd.f32 %v328_v31, %v327_v30  ;;  %v524_v30 = vlaneseq }
 0x36c   :  { %v330_v33 = vrot.slane %v329_v32, 2  ;;  %v2061_v31 = vshrl.u32 %v524_v30, 7 }
 0x36e   :  { %v331_v34 = vadd.f32 %v330_v33, %v329_v32  ;;  %v2063_v32 = vand.u32 127, %v524_v30  ;;  %v526_v33 = vadd.s32 8, %v2061_v31 }
 0x370   :  { %v332_v35 = vrot.slane %v331_v34, 1  ;;  %vm530_vm12 = vcmp.eq.s32.totalorder %v526_v33, %v2063_v32  ;;  %vm529_vm14 = vcmp.eq.s32.totalorder %v2061_v31, %v2063_v32 }
 0x372   :  { %v333_v36 = vadd.f32 %v332_v35, %v331_v34  ;;  %v537_v34 = vadd.s32 8, %v2063_v32  ;;  %v1553_v35 = vsel %vm530_vm12, 1.0, %v1819_v4 }
 0x374   :  { %v334_v37 = vmul.f32 0.0625, %v333_v36  ;;  %vm539_vm13 = vcmp.eq.s32.totalorder %v526_v33, %v537_v34  ;;  %v1555_v33 = vld [vmem:[%s2276_s17 + $0x8] sm:$0xff] }
 0x375   :  { %v1554_v36 = vsel %vm539_vm13, 1.0, %v1819_v4 }
 0x376   :  { %v335_v38 = vsub.f32 %v321_v25, %v334_v37  ;;  %v336_v39 = vsub.f32 %v322_v27, %v334_v37  ;;  %v2073_v37 = vsel %vm529_vm14, 1.0, %v1819_v4 }
 0x378   :  { %v337_v40 = vmul.f32 %v335_v38, %v335_v38  ;;  %v338_v41 = vmul.f32 %v336_v39, %v336_v39 }
 0x37a   :  { %v339_v42 = vsel %vm101_vm2, %v337_v40, 0.0  ;;  %v340_v43 = vsel %vm101_vm2, %v338_v41, 0.0 }
 0x37b   :  { %v341_v44 = vadd.f32 %v340_v43, %v339_v42 }
 0x37d   :  { %v342_v45 = vrot.slane %v341_v44, 4 }
 0x37f   :  { %v343_v46 = vadd.f32 %v342_v45, %v341_v44 }
 0x381   :  { %v344_v47 = vrot.slane %v343_v46, 2 }
 0x383   :  { %v345_v48 = vadd.f32 %v344_v47, %v343_v46 }
 0x385   :  { %v346_v49 = vrot.slane %v345_v48, 1 }
 0x387   :  { %v347_v50 = vadd.f32 %v346_v49, %v345_v48 }
 0x389   :  { %v348_v51 = vmul.f32 0.0625, %v347_v50 }
 0x38b   :  { %v349_v52 = vadd.f32 1e-05, %v348_v51 }
 0x38d   :  { %1790 = vrsqrt.f32 %v349_v52 }
 0x397   :  { %v1791_v53 = vpop.eup %1790 }
 0x398   :  { %v351_v55 = vmul.f32 %v1791_v53, %v335_v38  ;;  %v352_v56 = vmul.f32 %v1791_v53, %v336_v39  ;;  %v2075_v39 = vadd.f32 %v1554_v36, %v1553_v35  ;;  %v1557_v35 = vcombine.high %v1555_v33, %v1555_v33 }
 0x399   :  { %v1556_v36 = vcombine.low %v1555_v33, %v1555_v33 }
 0x39a   :  { %v359_v58 = vmul.f32 %v1542_v54, %v351_v55  ;;  %v360_v59 = vmul.f32 %v1542_v54, %v352_v56  ;;  %1558 = vmatprep.subr.msk.bf16.mxu1 %vm105_vm0, %v1557_v35 }
 0x39c   :  { %v367_v60 = vadd.f32 %v1543_v57, %v359_v58  ;;  %v368_v61 = vadd.f32 %v1543_v57, %v360_v59 }
 0x39e   :  { %v369_v62 = vmul.f32 %v367_v60, %v1967_v6  ;;  %v370_v63 = vmul.f32 %v368_v61, %v1975_v9  ;;  %v1544_v6 = vld [vmem:[%s2272_s13] ss:$0 sm:$0xff] }
 0x3a0   :  { %v372_v0 = vpack.c.bf16 %v370_v63, %v369_v62 }
 0x3a2   :  { %1676 = vmatmul.mubr.msk.bf16.vlgmr.msra.gmra.mrb[4].mxu1 %vm101_vm2, %v372_v0 }
 0x3a3   :  { %685 = vmatprep.mubr.bf16.mxu1 %v1818_v1 }
 0x475   :  { %v420_v9 = vpop.f32.mrb[4].mxu1 }
 0x476   :  { %v421_v5 = vadd.f32 %v1544_v6, %v420_v9  ;;  %v1677_v7 = vpop.f32.mrb[5].mxu1 }
 0x477   :  { %v423_v8 = vpop.f32.mrb[6].mxu1 }
 0x478   :  { %v429_v10 = vmul.f32 0.2, %v421_v5  ;;  %v424_v11 = vadd.f32 %v1544_v6, %v423_v8  ;;  %v1678_v12 = vpop.f32.mrb[7].mxu1  ;;  %vm427_vm7 = vcmp.ge.f32.partialorder %v421_v5, 0.0 }
 0x47a   :  { %vm428_vm8 = vcmp.ge.f32.partialorder %v424_v11, 0.0  ;;  %v430_v13 = vmul.f32 0.2, %v424_v11  ;;  %v431_v14 = vsel %vm427_vm7, %v421_v5, %v429_v10  ;;  %vm1518_vm7 = vcmask 9216  }
 0x47c   :  { %v432_v15 = vsel %vm428_vm8, %v424_v11, %v430_v13 }
 0x47d   :  { %v441_v16 = vpack.c.bf16 %v432_v15, %v431_v14 }
 0x47f   :  { %1688 = vmatmul.mubr.msk.bf16.vlgmr.msra.gmra.mrb[8].mxu0 %vm473_vm9, %v441_v16 }
 0x480   :  { %1255 = vmatprep.mubr.bf16.mxu0 %v1818_v1 }
 0x552   :  { %v511_v18 = vpop.f32.mrb[8].mxu0 }
 0x553   :  { %v512_v19 = vadd.f32 %v1546_v17, %v511_v18  ;;  %v1689_v20 = vpop.f32.mrb[9].mxu0  ;;  %v596_v18 = vld [vmem:[%s2275_s16] sm:$0x1] }
 0x554   :  { %v514_v21 = vpop.f32.mrb[10].mxu0 }
 0x555   :  { %v520_v22 = vmul.f32 0.2, %v512_v19  ;;  %v515_v23 = vadd.f32 %v1546_v17, %v514_v21  ;;  %v1690_v24 = vpop.f32.mrb[11].mxu0  ;;  %vm518_vm10 = vcmp.ge.f32.partialorder %v512_v19, 0.0 }
 0x557   :  { %v521_v25 = vmul.f32 0.2, %v515_v23  ;;  %v522_v26 = vsel %vm518_vm10, %v512_v19, %v520_v22  ;;  %vm519_vm11 = vcmp.ge.f32.partialorder %v515_v23, 0.0  ;;  %v600_v19 = vsub.s32 0, %v2061_v31 }
 0x558   :  { %v546_v27 = vsel %vm101_vm2, %v522_v26, 0.0 }
 0x559   :  { %547 = vadd.xlane.f32.xlu1 %v546_v27  ;;  %v523_v28 = vsel %vm519_vm11, %v515_v23, %v521_v25  ;;  %v1821_v27 = vmov 1  }
 0x55a   :  { %v549_v29 = vsel %vm101_vm2, %v523_v28, 0.0  ;;  %1739 = vset.pattern.permute.xlu1 %v1821_v27  ;;  %1740 = vset.pattern.permute.xlu0 %v1821_v27  ;;  %v1584_v27 = vld [vmem:[%s2276_s17 + $0x30] sm:$0xff] }
 0x55d   :  { %550 = vadd.xlane.f32.xlu1 %v549_v29 }
 0x5e6   :  { %v548_v38 = vpop.xlane.xlu1 %547 }
 0x5e7   :  { %v552_v40 = vmul.f32 %v2073_v37, %v548_v38  ;;  %v648_v38 = vsel %vm105_vm0, %v1556_v36, 0 }
 0x5e8   :  { %654 = vmatpush1.bf16.msra.mxu1 %v648_v38  ;;  %v1585_v38 = vcombine.low %v1584_v27, %v1584_v27 }
 0x5e9   :  { %v554_v43 = vsel %vm101_vm2, %v552_v40, 0.0  ;;  %v1822_v40 = vmov 6  }
 0x5ea   :  { %v551_v41 = vpop.xlane.xlu1 %550 }
 0x5eb   :  { %v553_v42 = vmul.f32 %v551_v41, %v2075_v39  ;;  %v624_v41 = vld [vmem:[%s2276_s17] sm:$0xff] }
 0x5ed   :  { %v555_v44 = vsel %vm101_vm2, %v553_v42, 0.0  ;;  %v1561_v42 = vcombine.high %v624_v41, %v624_v41 }
 0x5ee   :  { %v556_v45 = vadd.f32 %v555_v44, %v554_v43  ;;  %v1823_v43 = vmov 2   ;;  %v1824_v44 = vmov 7  }
 0x5ef   :  { %1562 = vmatprep.subr.msk.bf16.mxu1 %vm105_vm0, %v1561_v42 }
 0x5f0   :  { %v557_v46 = vrot.slane %v556_v45, 4 }
 0x5f2   :  { %v558_v47 = vadd.f32 %v557_v46, %v556_v45  ;;  %v1825_v45 = vmov 3   ;;  %v1826_v46 = vmov 4  }
 0x5f4   :  { %v559_v48 = vrot.slane %v558_v47, 2 }
 0x5f6   :  { %v560_v49 = vadd.f32 %v559_v48, %v558_v47  ;;  %v1827_v47 = vmov 5  }
 0x5f8   :  { %v561_v50 = vrot.slane %v560_v49, 1 }
 0x5fa   :  { %v562_v51 = vadd.f32 %v561_v50, %v560_v49  ;;  %v1560_v49 = vcombine.low %v624_v41, %v624_v41 }
 0x5fc   :  { %v563_v52 = vmul.f32 0.0625, %v562_v51  ;;  %v1564_v51 = vld [vmem:[%s2276_s17 + $0x10] sm:$0xff] }
 0x5fe   :  { %v565_v53 = vmul.f32 %v563_v52, %v2075_v39  ;;  %v564_v54 = vmul.f32 %v2073_v37, %v563_v52 }
 0x600   :  { %v569_v55 = vsel %vm101_vm2, %v565_v53, 0.0  ;;  %v566_v56 = vsel %vm101_vm2, %v564_v54, 0.0 }
 0x601   :  { %570 = vadd.xlane.f32.xlu1 %v569_v55  ;;  %567 = vadd.xlane.f32.xlu0 %v566_v56  ;;  %v705_v56 = vsel %vm105_vm0, %v1560_v49, 0 }
 0x68e   :  { %v571_v57 = vpop.xlane.xlu1 %570  ;;  %v568_v58 = vpop.xlane.xlu0 %567 }
 0x68f   :  { %v573_v59 = vsub.f32 %v523_v28, %v571_v57  ;;  %v572_v60 = vsub.f32 %v522_v26, %v568_v58  ;;  %v1566_v57 = vcombine.high %v1564_v51, %v1564_v51 }
 0x691   :  { %v574_v61 = vmul.f32 %v572_v60, %v572_v60  ;;  %v575_v63 = vmul.f32 %v573_v59, %v573_v59 }
 0x693   :  { %v576_v62 = vsel %vm101_vm2, %v574_v61, 0.0  ;;  %v579_v0 = vsel %vm101_vm2, %v575_v63, 0.0  ;;  %v1569_v61 = vld [vmem:[%s2276_s17 + $0x18] sm:$0xff] }
 0x694   :  { %577 = vadd.xlane.f32.xlu1 %v576_v62 }
 0x698   :  { %580 = vadd.xlane.f32.xlu1 %v579_v0 }
 0x721   :  { %v578_v2 = vpop.xlane.xlu1 %577 }
 0x722   :  { %v582_v3 = vmul.f32 %v2073_v37, %v578_v2 }
 0x724   :  { %v584_v5 = vsel %vm101_vm2, %v582_v3, 0.0  ;;  %v1571_v3 = vcombine.high %v1569_v61, %v1569_v61 }
 0x725   :  { %v581_v6 = vpop.xlane.xlu1 %580 }
 0x726   :  { %v583_v9 = vmul.f32 %v581_v6, %v2075_v39 }
 0x728   :  { %v585_v7 = vsel %vm101_vm2, %v583_v9, 0.0 }
 0x729   :  { %v586_v8 = vadd.f32 %v585_v7, %v584_v5  ;;  %v1570_v5 = vcombine.low %v1569_v61, %v1569_v61  ;;  %v1574_v7 = vld [vmem:[%s2276_s17 + $0x20] sm:$0xff] }
 0x72b   :  { %v587_v10 = vrot.slane %v586_v8, 4 }
 0x72d   :  { %v588_v11 = vadd.f32 %v587_v10, %v586_v8 }
 0x72f   :  { %v589_v12 = vrot.slane %v588_v11, 2 }
 0x731   :  { %v590_v13 = vadd.f32 %v589_v12, %v588_v11  ;;  %v849_v12 = vsel %vm105_vm0, %v1570_v5, 0  ;;  %v1776_v5 = vld [vmem:[%s2278_s19 + $0x58] sm:$0xff]  }
 0x733   :  { %v591_v14 = vrot.slane %v590_v13, 1 }
 0x735   :  { %v592_v15 = vadd.f32 %v591_v14, %v590_v13  ;;  %v1576_v13 = vcombine.high %v1574_v7, %v1574_v7 }
 0x737   :  { %v593_v16 = vmul.f32 0.0625, %v592_v15 }
 0x739   :  { %v594_v17 = vadd.f32 1e-05, %v593_v16  ;;  %v1575_v16 = vcombine.low %v1574_v7, %v1574_v7  ;;  %v1777_v7 = vld [vmem:[%s2278_s19 + $0x18] sm:$0xff]  }
 0x73b   :  { %1792 = vrsqrt.f32 %v594_v17  ;;  %v1579_v17 = vld [vmem:[%s2276_s17 + $0x28] sm:$0xff] }
 0x745   :  { %v1793_v20 = vpop.eup %1792 }
 0x746   :  { %v597_v21 = vmul.f32 %v1793_v20, %v596_v18 }
 0x748   :  { %v601_v22 = vrot.slane %v597_v21, %v600_v19 }
 0x74a   :  { %v602_v23 = vmul.f32 %v2073_v37, %v601_v22  ;;  %v603_v25 = vmul.f32 %v601_v22, %v2075_v39  ;;  %v923_v22 = vsel %vm105_vm0, %v1575_v16, 0  ;;  %v1785_v16 = vld [vmem:[%s2278_s19 + $0x38] sm:$0xff]  }
 0x74c   :  { %v604_v24 = vsel %vm101_vm2, %v602_v23, 0.0  ;;  %v607_v26 = vsel %vm101_vm2, %v603_v25, 0.0  ;;  %v1581_v23 = vcombine.high %v1579_v17, %v1579_v17 }
 0x74d   :  { %605 = vadd.xlane.f32.xlu1 %v604_v24 }
 0x751   :  { %608 = vadd.xlane.f32.xlu1 %v607_v26  ;;  %v1580_v26 = vcombine.low %v1579_v17, %v1579_v17  ;;  %v1207_v17 = vld [vmem:[%s2277_s18] sm:$0x3] }
 0x753   :  { %v997_v33 = vsel %vm105_vm0, %v1580_v26, 0 }
 0x7da   :  { %v606_v28 = vpop.xlane.xlu1 %605 }
 0x7db   :  { %v610_v29 = vmul.f32 %v606_v28, %v572_v60  ;;  %v1565_v60 = vcombine.low %v1564_v51, %v1564_v51 }
 0x7dd   :  { %627 = vperm.xlu1 %1739, %v610_v29   ;;  %v775_v2 = vsel %vm105_vm0, %v1565_v60, 0 }
 0x7de   :  { %v609_v30 = vpop.xlane.xlu1 %608 }
 0x7df   :  { %v611_v34 = vmul.f32 %v609_v30, %v573_v59 }
 0x7e1   :  { %1741 = vset.pattern.permute.xlu1 %v1818_v1  ;;  %631 = vperm.xlu0 %1740, %v611_v34  }
 0x7e2   :  { %614 = vperm.xlu1 %1741, %v610_v29  }
 0x7e5   :  { %1746 = vset.pattern.permute.xlu0 %v1822_v40 }
 0x7e6   :  { %619 = vperm.xlu1 %1741, %v611_v34   ;;  %1050 = vperm.xlu0 %1746, %v610_v29  }
 0x7ea   :  { %1742 = vset.pattern.permute.xlu1 %v1823_v43  ;;  %1749 = vset.pattern.permute.xlu0 %v1824_v44  ;;  %v1071_v43 = vsel %vm105_vm0, %v1585_v38, 0  ;;  %v1596_v38 = vld [vmem:[%s2279_s20] ss:$0 sm:$0xff] }
 0x7eb   :  { %754 = vperm.xlu1 %1742, %v610_v29   ;;  %1128 = vperm.xlu0 %1749, %v611_v34  }
 0x7ef   :  { %758 = vperm.xlu1 %1742, %v611_v34  }
 0x7f3   :  { %1743 = vset.pattern.permute.xlu1 %v1825_v45 }
 0x7f4   :  { %828 = vperm.xlu1 %1743, %v610_v29  }
 0x7f8   :  { %832 = vperm.xlu1 %1743, %v611_v34  }
 0x7fc   :  { %1744 = vset.pattern.permute.xlu1 %v1826_v46 }
 0x7fd   :  { %902 = vperm.xlu1 %1744, %v610_v29  }
 0x801   :  { %906 = vperm.xlu1 %1744, %v611_v34  }
 0x805   :  { %1745 = vset.pattern.permute.xlu1 %v1827_v47 }
 0x806   :  { %976 = vperm.xlu1 %1745, %v610_v29  }
 0x80a   :  { %980 = vperm.xlu1 %1745, %v611_v34  }
 0x80e   :  { %1747 = vset.pattern.permute.xlu1 %v1822_v40  ;;  %v1589_v40 = vld [vmem:[%s2276_s17 + $0x38] sm:$0xff] }
 0x80f   :  { %1054 = vperm.xlu1 %1747, %v611_v34   ;;  %v1586_v34 = vcombine.high %v1584_v27, %v1584_v27 }
 0x813   :  { %1748 = vset.pattern.permute.xlu1 %v1824_v44  ;;  %v1591_v44 = vcombine.high %v1589_v40, %v1589_v40 }
 0x814   :  { %1124 = vperm.xlu1 %1748, %v610_v29  }
 0x85c   :  { %v628_v48 = vpop.permute.xlu1 %627 }
 0x85d   :  { %v634_v52 = vmul.f32 %v2073_v37, %v628_v48  ;;  %v1590_v48 = vcombine.low %v1589_v40, %v1589_v40 }
 0x85f   :  { %v1145_v51 = vsel %vm105_vm0, %v1590_v48, 0 }
 0x860   :  { %v632_v50 = vpop.permute.xlu0 %631 }
 0x861   :  { %v635_v53 = vmul.f32 %v632_v50, %v2075_v39  ;;  %v615_v54 = vpop.permute.xlu1 %614 }
 0x862   :  { %v622_v62 = vmul.f32 %v2073_v37, %v615_v54 }
 0x863   :  { %v638_v55 = vpack.c.bf16 %v635_v53, %v634_v52 }
 0x865   :  { %1559 = vmatmul.mubr.msk.bf16.vlgmr.msra.gmra.mrb[8].mxu1 %vm101_vm2, %v638_v55  ;;  %v620_v58 = vpop.permute.xlu1 %619  ;;  %v1051_v46 = vpop.permute.xlu0 %1050 }
 0x866   :  { %711 = vmatpush1.bf16.msra.mxu1 %v705_v56  ;;  %742 = vmatprep.mubr.bf16.mxu1 %v1818_v1  ;;  %v623_v59 = vmul.f32 %v620_v58, %v2075_v39  ;;  %v1057_v49 = vmul.f32 %v2073_v37, %v1051_v46 }
 0x867   :  { %1567 = vmatprep.subr.msk.bf16.mxu1 %vm105_vm0, %v1566_v57  ;;  %v1197_v57 = vmul.u32 8, %v2061_v31 }
 0x868   :  { %v625_v0 = vpack.c.bf16 %v623_v59, %v622_v62 }
 0x869   :  { %v1199_v58 = vadd.s32 8, %v1197_v57  ;;  %vm1198_vm15 = vcmp.ge.s32.totalorder %v2063_v32, %v1197_v57 }
 0x86a   :  { %v755_v63 = vpop.permute.xlu1 %754  ;;  %v1129_v53 = vpop.permute.xlu0 %1128 }
 0x86b   :  { %v761_v8 = vmul.f32 %v2073_v37, %v755_v63  ;;  %v1132_v55 = vmul.f32 %v1129_v53, %v2075_v39 }
 0x86e   :  { %v759_v6 = vpop.permute.xlu1 %758 }
 0x86f   :  { %v762_v9 = vmul.f32 %v759_v6, %v2075_v39  ;;  %v1774_v6 = vld [vmem:[%s2278_s19 + $0x50] sm:$0xff]  }
 0x871   :  { %1563 = vmatmul.mubr.msk.bf16.vlgmr.msra.gmra.mrb[8].mxu1 %vm101_vm2, %v625_v0  ;;  %v765_v11 = vpack.c.bf16 %v762_v9, %v761_v8  ;;  %v1775_v9 = vld [vmem:[%s2278_s19 + $0x10] sm:$0xff]   ;;  %v1778_v8 = vld [vmem:[%s2278_s19 + $0x60] sm:$0xff]  }
 0x872   :  { %781 = vmatpush1.bf16.msra.mxu1 %v775_v2  ;;  %812 = vmatprep.mubr.bf16.mxu1 %v1818_v1  ;;  %v1772_v2 = vld [vmem:[%s2278_s19 + $0x48] sm:$0xff]  }
 0x873   :  { %1572 = vmatprep.subr.msk.bf16.mxu1 %vm105_vm0, %v1571_v3  ;;  %v829_v10 = vpop.permute.xlu1 %828  ;;  %v1773_v3 = vld [vmem:[%s2278_s19 + $0x8] sm:$0xff]  }
 0x874   :  { %v835_v18 = vmul.f32 %v2073_v37, %v829_v10  ;;  %v1779_v10 = vld [vmem:[%s2278_s19 + $0x20] sm:$0xff]  }
 0x877   :  { %v833_v14 = vpop.permute.xlu1 %832 }
 0x878   :  { %v836_v15 = vmul.f32 %v833_v14, %v2075_v39  ;;  %v1783_v14 = vld [vmem:[%s2278_s19 + $0x30] sm:$0xff]  }
 0x87a   :  { %v839_v21 = vpack.c.bf16 %v836_v15, %v835_v18  ;;  %v1784_v15 = vld [vmem:[%s2278_s19 + $0x78] sm:$0xff]   ;;  %v1215_v18 = vsub.s32 1, %v2061_v31  ;;  %v1786_v31 = vld [vmem:[%s2280_s21] sm:$0xff]  }
 0x87c   :  { %v903_v20 = vpop.permute.xlu1 %902 }
 0x87d   :  { %1568 = vmatmul.mubr.msk.bf16.vlgmr.msra.gmra.mrb[8].mxu1 %vm101_vm2, %v765_v11  ;;  %v909_v28 = vmul.f32 %v2073_v37, %v903_v20  ;;  %v1780_v11 = vld [vmem:[%s2278_s19 + $0x68] sm:$0xff]   ;;  %v1212_v20 = vrot.slane %v1207_v17, %v600_v19 }
 0x87e   :  { %855 = vmatpush1.bf16.msra.mxu1 %v849_v12  ;;  %886 = vmatprep.mubr.bf16.mxu1 %v1818_v1  ;;  %v1781_v12 = vld [vmem:[%s2278_s19 + $0x28] sm:$0xff]  }
 0x87f   :  { %1577 = vmatprep.subr.msk.bf16.mxu1 %vm105_vm0, %v1576_v13  ;;  %v1782_v13 = vld [vmem:[%s2278_s19 + $0x70] sm:$0xff]   ;;  %v1787_v19 = vld [vmem:[%s2280_s21 + $0x8] sm:$0xff]   ;;  %s1828_s21 = smov [#allocation2]  }
 0x880   :  { %v907_v24 = vpop.permute.xlu1 %906  ;;  %s1526_s25 = sshll.u32 %s1828_s21, 4  ;;  %s1527_s25 = int_to_ptr.vmem [resolvable:$true] %s1526_s25 }
 0x881   :  { %v910_v25 = vmul.f32 %v907_v24, %v2075_v39  ;;  %s1794_s20 = scalar_lea.vmem %s1527_s25, 32  ;;  %p1799_p1 = scmp.lt.s32.totalorder %s1527_s25, %s1527_s25 }
 0x882   :  { %p1795_p0 = scmp.ne.s32.totalorder %s1527_s25, %s1794_s20  ;;  %p1800_p2 = scmp.lt.s32.totalorder %s1794_s20, %s1794_s20 }
 0x883   :  { %v913_v30 = vpack.c.bf16 %v910_v25, %v909_v28 }
 0x884   :  { %p1801_p3 = por %p1800_p2, %p1799_p1 }
 0x885   :  { %v977_v29 = vpop.permute.xlu1 %976 }
 0x886   :  { %v983_v41 = vmul.f32 %v2073_v37, %v977_v29  ;;  %p1802_p4 = pnand %p1801_p3, %p1795_p0 }
 0x889   :  { %1573 = vmatmul.mubr.msk.bf16.vlgmr.msra.gmra.mrb[8].mxu1 %vm101_vm2, %v839_v21  ;;  %v981_v35 = vpop.permute.xlu1 %980  ;;  %v1216_v21 = vrot.slane %v1207_v17, %v1215_v18 }
 0x88a   :  { %929 = vmatpush1.bf16.msra.mxu1 %v923_v22  ;;  %960 = vmatprep.mubr.bf16.mxu1 %v1818_v1  ;;  %v984_v36 = vmul.f32 %v981_v35, %v2075_v39 }
 0x88b   :  { %1582 = vmatprep.subr.msk.bf16.mxu1 %vm105_vm0, %v1581_v23 }
 0x88c   :  { %v987_v42 = vpack.c.bf16 %v984_v36, %v983_v41 }
 0x88e   :  { %v1055_v45 = vpop.permute.xlu1 %1054 }
 0x88f   :  { %v1058_v47 = vmul.f32 %v1055_v45, %v2075_v39  ;;  %v1770_v39 = vld [vmem:[%s2278_s19 + $0x40] sm:$0xff]  }
 0x891   :  { %v1061_v50 = vpack.c.bf16 %v1058_v47, %v1057_v49  ;;  %v1613_v47 = vld [vmem:[%s2281_s22] ss:$0 sm:$0xff] }
 0x893   :  { %v1125_v52 = vpop.permute.xlu1 %1124 }
 0x894   :  { %v1131_v54 = vmul.f32 %v2073_v37, %v1125_v52 }
 0x895   :  { %1578 = vmatmul.mubr.msk.bf16.vlgmr.msra.gmra.mrb[8].mxu1 %vm101_vm2, %v913_v30 }
 0x896   :  { %1003 = vmatpush1.bf16.msra.mxu1 %v997_v33  ;;  %1034 = vmatprep.mubr.bf16.mxu1 %v1818_v1  ;;  %v1135_v56 = vpack.c.bf16 %v1132_v55, %v1131_v54 }
 0x897   :  { %1587 = vmatprep.subr.msk.bf16.mxu1 %vm105_vm0, %v1586_v34 }
 0x8a1   :  { %1583 = vmatmul.mubr.msk.bf16.vlgmr.msra.gmra.mrb[8].mxu1 %vm101_vm2, %v987_v42 }
 0x8a2   :  { %1077 = vmatpush1.bf16.msra.mxu1 %v1071_v43  ;;  %1108 = vmatprep.mubr.bf16.mxu1 %v1818_v1 }
 0x8a3   :  { %1592 = vmatprep.subr.msk.bf16.mxu1 %vm105_vm0, %v1591_v44  ;;  %vm1200_vm0 = vcmp.lt.s32.totalorder %v2063_v32, %v1199_v58  ;;  %v1771_v32 = vld [vmem:[%s2278_s19] sm:$0xff]  }
 0x8a4   :  { %vm1201_vm3 = vmand %vm1198_vm15, %vm1200_vm0 }
 0x8a5   :  { %v1594_v37 = vsel %vm1201_vm3, 1.0, %v1819_v4 }
 0x8a6   :  { %v1204_v0 = vpack.c.bf16 %v1594_v37, %v1594_v37 }
 0x8ad   :  { %1588 = vmatmul.mubr.msk.bf16.vlgmr.msra.gmra.mrb[8].mxu1 %vm101_vm2, %v1061_v50 }
 0x8ae   :  { %1151 = vmatpush1.bf16.msra.mxu1 %v1145_v51  ;;  %1182 = vmatprep.mubr.bf16.mxu1 %v1818_v1 }
 0x8b9   :  { %1593 = vmatmul.mubr.msk.bf16.vlgmr.msra.gmra.mrb[8].mxu1 %vm101_vm2, %v1135_v56  ;;  %vm1219_vm2 = vcmask 130048  }
 0x98c   :  { %v1184_v59 = vpop.f32.mrb[8].mxu1 }
 0x98d   :  { %v1186_v60 = vpop.f32.mrb[9].mxu1 }
 0x98e   :  { %v1188_v1 = vpop.f32.mrb[10].mxu1 }
 0x98f   :  { %v1205_v61 = vpack.c.bf16 %v1188_v1, %v1184_v59  ;;  %v1190_v62 = vpop.f32.mrb[11].mxu1 }
 0x990   :  { %v1206_v63 = vpack.c.bf16 %v1190_v62, %v1186_v60 }
 0x992   :  { %1223 = vmatprep.subr.bf16.mxu0 %v1206_v63 }
 0x993   :  { %1224 = vmatpush1.bf16.msra.mxu0 %v1205_v61 }
 0x994   :  { %1630 = vmatprep.subr.bf16.mxu0 %v1770_v39 }
 0x996   :  { %1595 = vmatmul.mubr.msk.bf16.vlgmr.msra.gmra.mrb[12].mxu0 %vm1219_vm2, %v1204_v0 }
 0x997   :  { %1631 = vmatpush3.bf16.msra.mxu0 %v1771_v32 }
 0x998   :  { %1632 = vmatprep.subr.bf16.mxu0 %v1772_v2 }
 0x99b   :  { %1633 = vmatpush3.bf16.msra.mxu0 %v1773_v3 }
 0x99c   :  { %1634 = vmatprep.subr.bf16.mxu0 %v1774_v6 }
 0x99f   :  { %1635 = vmatpush3.bf16.msra.mxu0 %v1775_v9 }
 0x9a0   :  { %1636 = vmatprep.subr.bf16.mxu0 %v1776_v5 }
 0x9a3   :  { %1637 = vmatpush3.bf16.msra.mxu0 %v1777_v7 }
 0x9a4   :  { %1638 = vmatprep.subr.bf16.mxu0 %v1778_v8 }
 0x9a7   :  { %1639 = vmatpush3.bf16.msra.mxu0 %v1779_v10 }
 0x9a8   :  { %1640 = vmatprep.subr.bf16.mxu0 %v1780_v11 }
 0x9ab   :  { %1641 = vmatpush3.bf16.msra.mxu0 %v1781_v12 }
 0x9ac   :  { %1642 = vmatprep.subr.bf16.mxu0 %v1782_v13 }
 0x9af   :  { %1643 = vmatpush3.bf16.msra.mxu0 %v1783_v14 }
 0x9b0   :  { %1644 = vmatprep.subr.bf16.mxu0 %v1784_v15 }
 0x9b3   :  { %1645 = vmatpush3.bf16.msra.mxu0 %v1785_v16 }
 0x9b4   :  { %1691 = vmatprep.subr.bf16.mxu0 %v1819_v4 }
 0xa69   :  { %v1257_v22 = vpop.f32.mrb[12].mxu0 }
 0xa6a   :  { %v1258_v23 = vadd.f32 %v1257_v22, %v1212_v20  ;;  %v1259_v24 = vpop.f32.mrb[13].mxu0 }
 0xa6b   :  { %v1260_v25 = vadd.f32 %v1259_v24, %v1216_v21  ;;  %v1261_v26 = vpop.f32.mrb[14].mxu0 }
 0xa6c   :  { %vm1264_vm4 = vcmp.ge.f32.partialorder %v1258_v23, 0.0  ;;  %v1266_v27 = vmul.f32 0.2, %v1258_v23  ;;  %v1262_v28 = vpop.f32.mrb[15].mxu0 }
 0xa6d   :  { %vm1265_vm5 = vcmp.ge.f32.partialorder %v1260_v25, 0.0  ;;  %v1267_v29 = vmul.f32 0.2, %v1260_v25 }
 0xa6e   :  { %v1268_v30 = vsel %vm1264_vm4, %v1258_v23, %v1266_v27 }
 0xa6f   :  { %v1269_v33 = vsel %vm1265_vm5, %v1260_v25, %v1267_v29  ;;  %v1302_v35 = vpack.c.bf16 %v1268_v30, %v1268_v30 }
 0xa70   :  { %v1303_v34 = vpack.c.bf16 %v1269_v33, %v1269_v33 }
 0xa72   :  { %1439 = vmatprep.mubr.bf16.mxu0 %v1303_v34 }
 0xa73   :  { %1440 = vmatmul.mubr.bf16.vlgmr.msra.gmra.mrb[16].mxu0 %v1302_v35 }
 0xa74   :  { %1695 = vmatprep.mubr.msk.bf16.mxu0 %vm1820_vm1, %v1819_v4  ;;  %1692 = vmatpush3.bf16.msra.mxu0 %v1786_v31 }
 0xa75   :  { %1693 = vmatprep.subr.bf16.mxu0 %v1819_v4 }
 0xa78   :  { %1694 = vmatpush3.bf16.msra.mxu0 %v1787_v19 }
 0xb46   :  { %v1646_v36 = vpop.f32.mrb[16].mxu0 }
 0xb47   :  { %v1647_v40 = vpop.f32.mrb[17].mxu0 }
 0xb48   :  { %v1648_v41 = vadd.f32 %v1647_v40, %v1646_v36  ;;  %v1649_v42 = vpop.f32.mrb[18].mxu0 }
 0xb49   :  { %v1650_v43 = vpop.f32.mrb[19].mxu0 }
 0xb4a   :  { %v1442_v44 = vadd.f32 %v1648_v41, %v1596_v38 }
 0xb4c   :  { %vm1447_vm1 = vcmp.ge.f32.partialorder %v1442_v44, 0.0  ;;  %v1448_v45 = vmul.f32 0.2, %v1442_v44 }
 0xb4e   :  { %v1449_v46 = vsel %vm1447_vm1, %v1442_v44, %v1448_v45 }
 0xb4f   :  { %v1454_v4 = vpack.c.bf16 %v1449_v46, %v1449_v46 }
 0xb51   :  { %1696 = vmatmul.mubr.msk.bf16.vlgmr.msra.gmra.mrb[20].mxu0 %vm1474_vm6, %v1454_v4 }
 0xc24   :  { %v1512_v48 = vpop.f32.mrb[20].mxu0 }
 0xc25   :  { %v1513_v49 = vadd.f32 %v1613_v47, %v1512_v48  ;;  %v1697_v50 = vpop.f32.mrb[21].mxu0 }
 0xc26   :  { %v1515_v51 = vpop.f32.mrb[22].mxu0 }
 0xc27   :  { %v1698_v52 = vpop.f32.mrb[23].mxu0  ;;  %1519 = vst.msk [vmem:[#allocation2] sm:$0x3] %vm1518_vm7, %v1513_v49 }
 0xc28   :  { %1805 = shalt.err (!%p1802_p4)
}
 0xc29   :  { %s1806_s22 = scalar_lea.hbm %s2282_s23, 32 }
 0xc2a   :  { %p1807_p5 = scmp.ne.s32.totalorder %s2282_s23, %s1806_s22  ;;  %p1810_p6 = scmp.lt.u32.totalorder %s1806_s22, %s2282_s23 }
 0xc2c   :  { %p1812_p7 = pnand %p1810_p6, %p1807_p5 }
 0xc2e   :  { %1815 = shalt.err (!%p1812_p7)
}
 0xc2f   :  { %1529 = dma.vmem_to_hbm [thread:$0]  %s1527_s25, 32, %s2282_s23, [#allocation3]  }
 0xc30   :  { %1816 = dma.done.wait [#allocation3], 32  }
 0xc31   :  { %1817 = vsyncadd [#allocation3], 4294967264 }
 0xc32   :  { %1533 = vsyncpa [#allocation3], 1 }

</bundles_post_ra>
